<compile_context>
chip_gen: v7x
topology: tpu7x:2x2x1
jax: 0.10.0
libtpu: 0.0.40
codegen_flags: <defaults>
</compile_context>

<pallas_src>
import functools

import numpy as np
import jax
import jax.numpy as jnp
from jax import lax
from jax.experimental import pallas as pl
from jax.experimental.pallas import tpu as pltpu

BATCH = 4          # small batch (module hardcodes batch_size; we use 4)
IM_H = 32          # spatial size must be 32: five stride-2 halvings -> 1x1
IM_W = 32
BN_EPS = 1e-5
LEAKY_SLOPE = 0.2


# ----------------------------------------------------------------------------
# Row ordering: quad-tree order of the layer-1 output grid such that, at every
# subsequent layer, the four taps of each coarse output cell are the four
# contiguous quarters of the row dimension (so space-to-depth == concat).
# ----------------------------------------------------------------------------
def _row_order(s):
    """Positions (oh, ow) of an s x s grid in block-recursive order."""
    if s == 1:
        return np.zeros((1, 2), dtype=np.int32)
    coarse = _row_order(s // 2)
    q = coarse.shape[0]
    out = np.zeros((4 * q, 2), dtype=np.int32)
    for j in range(4):
        kh, kw = divmod(j, 2)
        out[j * q:(j + 1) * q, 0] = 2 * coarse[:, 0] + kh
        out[j * q:(j + 1) * q, 1] = 2 * coarse[:, 1] + kw
    return out


_L1_ORDER = _row_order(IM_H // 2)                              # (256, 2)
_L1_FLAT = _L1_ORDER[:, 0] * (IM_W // 2) + _L1_ORDER[:, 1]     # np.int32 (256,)


# ----------------------------------------------------------------------------
# Fused Pallas kernel: whole discriminator forward for one image per grid step
# ----------------------------------------------------------------------------
def _disc_fused_kernel(p0_ref, w0_ref, w1_ref, w2_ref, w3_ref, w4_ref,
                       t0_ref, t1_ref, t2_ref, t3_ref, t4_ref, o_ref):
    def merge(h):
        # Space-to-depth for the next 2x2 / stride-2 conv.  Rows are stored in
        # block-recursive order, so the four taps of every coarse cell are the
        # four contiguous row-quarters; K-order becomes (kh, kw, c) as needed.
        q = h.shape[0] // 4
        return jnp.concatenate(
            [h[0:q], h[q:2 * q], h[2 * q:3 * q], h[3 * q:4 * q]], axis=1)

    def conv_bn_lrelu(h, w_ref, t_ref):
        # BN scale already folded into W; only the per-channel shift remains.
        y = jnp.dot(h, w_ref[...], preferred_element_type=jnp.float32)
        y = y + t_ref[...]
        return jnp.where(y >= 0.0, y, LEAKY_SLOPE * y)

    h = p0_ref[0]                                  # (256, 12)   layer-1 patches
    h = conv_bn_lrelu(h, w0_ref, t0_ref)           # (256, 32)
    h = merge(h)                                   # (64, 128)
    h = conv_bn_lrelu(h, w1_ref, t1_ref)           # (64, 64)
    h = merge(h)                                   # (16, 256)
    h = conv_bn_lrelu(h, w2_ref, t2_ref)           # (16, 128)
    h = merge(h)                                   # (4, 512)
    h = conv_bn_lrelu(h, w3_ref, t3_ref)           # (4, 256)
    h = merge(h)                                   # (1, 1024)
    # Final conv (OC=1): VPU multiply + lane reduction instead of a 1-column
    # MXU matmul; sigmoid via EUP-approx reciprocal.
    y = jnp.sum(h * w4_ref[...], axis=-1, keepdims=True) + t4_ref[...]
    o_ref[0] = pl.reciprocal(1.0 + jnp.exp(-y), approx=True)


# ----------------------------------------------------------------------------
# Parameter / input preparation (hoisted out of the kernel & per-layer loop)
# ----------------------------------------------------------------------------
def prepare_params(params):
    """Fold conv bias + eval-mode BN into (weight-matrix, shift) per layer."""
    prepared = []
    for (w, b, bn) in params:
        oc, ic, kh, kw = w.shape
        wmat = jnp.transpose(w, (2, 3, 1, 0)).reshape(kh * kw * ic, oc)
        if bn is not None:
            gamma, beta, mean, var = bn
            s = gamma / jnp.sqrt(var + BN_EPS)
            wmat = wmat * s[None, :]                 # fold BN scale into W
            t = (b - mean) * s + beta
        else:
            t = b
        prepared.append((wmat, t.reshape(1, oc)))
    # Final layer (OC=1): lane-dense row vector for the in-kernel reduction.
    w_last, t_last = prepared[-1]
    prepared[-1] = (w_last.reshape(1, -1), t_last.reshape(1, 1))
    return prepared


def _im2col_l0(x_nchw):
    """Input -> layer-1 patch matrices, rows in block-recursive order."""
    # Matches the module's x.view(batch, 3, im_width, im_height) (square, so
    # the H/W label swap is a no-op; see correctness note).
    x = x_nchw.reshape(BATCH, 3, IM_W, IM_H).astype(jnp.float32)
    x = jnp.transpose(x, (0, 2, 3, 1))                       # NHWC
    p = x.reshape(BATCH, IM_H // 2, 2, IM_W // 2, 2, 3)
    p = p.transpose(0, 1, 3, 2, 4, 5)                        # (N,oh,ow,kh,kw,c)
    p = p.reshape(BATCH, (IM_H // 2) * (IM_W // 2), 12)      # (kh,kw,c) K-order
    return p[:, _L1_FLAT, :]                                 # reorder rows


def _full_spec(arr):
    return pl.BlockSpec(arr.shape, lambda b: (0, 0))


@jax.jit
def discriminator_image_forward(x_nchw, prepared):
    """Pallas implementation of DiscriminatorImage.forward (eval-mode BN)."""
    (w0, t0), (w1, t1), (w2, t2), (w3, t3), (w4, t4) = prepared
    p0 = _im2col_l0(x_nchw)                                  # (B, 256, 12)

    flops = 2 * BATCH * (256 * 12 * 32 + 64 * 128 * 64 + 16 * 256 * 128
                         + 4 * 512 * 256 + 1024)
    bytes_accessed = 4 * (p0.size + w0.size + w1.size + w2.size + w3.size
                          + w4.size + t0.size + t1.size + t2.size + t3.size
                          + t4.size + BATCH)

    out = pl.pallas_call(
        _disc_fused_kernel,
        out_shape=jax.ShapeDtypeStruct((BATCH, 1, 1), jnp.float32),
        grid_spec=pltpu.PrefetchScalarGridSpec(
            num_scalar_prefetch=0,
            grid=(BATCH,),
            in_specs=[
                pl.BlockSpec((1,) + p0.shape[1:], lambda b: (b, 0, 0)),
                _full_spec(w0), _full_spec(w1), _full_spec(w2),
                _full_spec(w3), _full_spec(w4),
                _full_spec(t0), _full_spec(t1), _full_spec(t2),
                _full_spec(t3), _full_spec(t4),
            ],
            out_specs=pl.BlockSpec((1, 1, 1), lambda b: (b, 0, 0)),
        ),
        compiler_params=pltpu.CompilerParams(
            dimension_semantics=("parallel",)),
        cost_estimate=pl.CostEstimate(
            flops=flops, transcendentals=2 * BATCH,
            bytes_accessed=bytes_accessed),
    )(p0, w0, w1, w2, w3, w4, t0, t1, t2, t3, t4)

    return out.reshape(BATCH, 1, 1, 1)                       # NCHW (N,1,1,1)


# ----------------------------------------------------------------------------
# Plain-JAX reference (same semantics) for correctness check
# ----------------------------------------------------------------------------
def reference_forward(x_nchw, params):
    h = x_nchw.reshape(BATCH, 3, IM_W, IM_H).astype(jnp.float32)
    for i, (w, b, bn) in enumerate(params):
        h = lax.conv_general_dilated(
            h, w, window_strides=(2, 2), padding="VALID",
            dimension_numbers=("NCHW", "OIHW", "NCHW"),
            precision=lax.Precision.HIGHEST)
        h = h + b[None, :, None, None]
        if bn is not None:
            gamma, beta, mean, var = bn
            h = (h - mean[None, :, None, None]) / jnp.sqrt(
                var[None, :, None, None] + BN_EPS)
            h = gamma[None, :, None, None] * h + beta[None, :, None, None]
            h = jnp.where(h >= 0.0, h, LEAKY_SLOPE * h)
        else:
            h = jax.nn.sigmoid(h)
    return h


# ----------------------------------------------------------------------------
# Deterministic parameter construction (shapes from the module's __init__)
# ----------------------------------------------------------------------------
def make_params(key):
    # (in_ch, out_ch, has_bn) for op1..op5; all convs are k=2, s=2, p=0.
    cfg = [(3, 32, True), (32, 64, True), (64, 128, True),
           (128, 256, True), (256, 1, False)]
    params = []
    for (cin, cout, has_bn) in cfg:
        key, kw, kb, kg, kbt, km, kv = jax.random.split(key, 7)
        w = 0.05 * jax.random.normal(kw, (cout, cin, 2, 2), jnp.float32)  # OIHW
        b = 0.05 * jax.random.normal(kb, (cout,), jnp.float32)
        if has_bn:
            gamma = 1.0 + 0.1 * jax.random.normal(kg, (cout,), jnp.float32)
            beta = 0.1 * jax.random.normal(kbt, (cout,), jnp.float32)
            mean = 0.1 * jax.random.normal(km, (cout,), jnp.float32)
            var = jax.random.uniform(kv, (cout,), jnp.float32, 0.5, 1.5)
            bn = (gamma, beta, mean, var)
        else:
            bn = None
        params.append((w, b, bn))
    return params


if __name__ == "__main__":
    root = jax.random.PRNGKey(0)
    k_x, k_p = jax.random.split(root)
    x = jax.random.normal(k_x, (BATCH, 3, IM_H, IM_W), jnp.float32)
    params = make_params(k_p)
    prepared = prepare_params(params)   # done once, outside the forward path

    out = jax.block_until_ready(discriminator_image_forward(x, prepared))
    ref = jax.block_until_ready(reference_forward(x, params))

    assert out.shape == (BATCH, 1, 1, 1), out.shape
    assert jnp.allclose(out, ref, rtol=1e-2, atol=1e-2), (
        float(jnp.max(jnp.abs(out - ref))))

    print("KERNEL_OK")
</pallas_src>

<mosaic_0001>
module attributes {stable_mosaic.version = 11 : i64} {
  func.func @_disc_fused_kernel(%arg0: i32, %arg1: memref<1x256x12xf32, #tpu.memory_space<vmem>>, %arg2: memref<12x32xf32, #tpu.memory_space<vmem>>, %arg3: memref<128x64xf32, #tpu.memory_space<vmem>>, %arg4: memref<256x128xf32, #tpu.memory_space<vmem>>, %arg5: memref<512x256xf32, #tpu.memory_space<vmem>>, %arg6: memref<1x1024xf32, #tpu.memory_space<vmem>>, %arg7: memref<1x32xf32, #tpu.memory_space<vmem>>, %arg8: memref<1x64xf32, #tpu.memory_space<vmem>>, %arg9: memref<1x128xf32, #tpu.memory_space<vmem>>, %arg10: memref<1x256xf32, #tpu.memory_space<vmem>>, %arg11: memref<1x1xf32, #tpu.memory_space<vmem>>, %arg12: memref<1x1x1xf32, #tpu.memory_space<vmem>>) attributes {dimension_semantics = [#tpu.dimension_semantics<parallel>], iteration_bounds = array<i64: 4>, scalar_prefetch = 0 : i64, scratch_operands = 0 : i64, tpu.core_type = #tpu.core_type<tc>, window_params = [{transform_indices = @transform_0, window_bounds = array<i64: 1, 256, 12>}, {pipeline_mode = #tpu.pipeline_mode<synchronous>, transform_indices = @transform_1, window_bounds = array<i64: 12, 32>}, {pipeline_mode = #tpu.pipeline_mode<synchronous>, transform_indices = @transform_2, window_bounds = array<i64: 128, 64>}, {pipeline_mode = #tpu.pipeline_mode<synchronous>, transform_indices = @transform_3, window_bounds = array<i64: 256, 128>}, {pipeline_mode = #tpu.pipeline_mode<synchronous>, transform_indices = @transform_4, window_bounds = array<i64: 512, 256>}, {pipeline_mode = #tpu.pipeline_mode<synchronous>, transform_indices = @transform_5, window_bounds = array<i64: 1, 1024>}, {pipeline_mode = #tpu.pipeline_mode<synchronous>, transform_indices = @transform_6, window_bounds = array<i64: 1, 32>}, {pipeline_mode = #tpu.pipeline_mode<synchronous>, transform_indices = @transform_7, window_bounds = array<i64: 1, 64>}, {pipeline_mode = #tpu.pipeline_mode<synchronous>, transform_indices = @transform_8, window_bounds = array<i64: 1, 128>}, {pipeline_mode = #tpu.pipeline_mode<synchronous>, transform_indices = @transform_9, window_bounds = array<i64: 1, 256>}, {pipeline_mode = #tpu.pipeline_mode<synchronous>, transform_indices = @transform_10, window_bounds = array<i64: 1, 1>}, {transform_indices = @transform_11, window_bounds = array<i64: 1, 1, 1>}]} {
    %c0 = arith.constant 0 : index
    %c0_0 = arith.constant 0 : index
    %c0_1 = arith.constant 0 : index
    %0 = vector.load %arg1[%c0, %c0_0, %c0_1] : memref<1x256x12xf32, #tpu.memory_space<vmem>>, vector<1x256x12xf32>
    %1 = vector.shape_cast %0 : vector<1x256x12xf32> to vector<256x12xf32>
    %c0_2 = arith.constant 0 : index
    %c0_3 = arith.constant 0 : index
    %2 = vector.load %arg2[%c0_2, %c0_3] : memref<12x32xf32, #tpu.memory_space<vmem>>, vector<12x32xf32>
    %cst = arith.constant dense<0.000000e+00> : vector<256x32xf32>
    %3 = tpu.matmul %1, %2, %cst {dimension_numbers = #tpu.dot_dimension_numbers<[1], [0], [0], [1], [0, 0, 1, 1], [], []>} : vector<256x12xf32>, vector<12x32xf32>, vector<256x32xf32> -> vector<256x32xf32>
    %c0_4 = arith.constant 0 : index
    %c0_5 = arith.constant 0 : index
    %4 = vector.load %arg7[%c0_4, %c0_5] : memref<1x32xf32, #tpu.memory_space<vmem>>, vector<1x32xf32>
    %5 = vector.broadcast %4 : vector<1x32xf32> to vector<256x32xf32>
    %6 = arith.addf %3, %5 : vector<256x32xf32>
    %cst_6 = arith.constant 0.000000e+00 : f32
    %7 = vector.broadcast %cst_6 : f32 to vector<256x32xf32>
    %8 = arith.cmpf oge, %6, %7 : vector<256x32xf32>
    %cst_7 = arith.constant 2.000000e-01 : f32
    %9 = vector.broadcast %cst_7 : f32 to vector<256x32xf32>
    %10 = arith.mulf %9, %6 : vector<256x32xf32>
    %11 = arith.select %8, %6, %10 : vector<256x32xi1>, vector<256x32xf32>
    %12 = vector.extract_strided_slice %11 {offsets = [0, 0], sizes = [64, 32], strides = [1, 1]} : vector<256x32xf32> to vector<64x32xf32>
    %13 = vector.extract_strided_slice %11 {offsets = [64, 0], sizes = [64, 32], strides = [1, 1]} : vector<256x32xf32> to vector<64x32xf32>
    %14 = vector.extract_strided_slice %11 {offsets = [128, 0], sizes = [64, 32], strides = [1, 1]} : vector<256x32xf32> to vector<64x32xf32>
    %15 = vector.extract_strided_slice %11 {offsets = [192, 0], sizes = [64, 32], strides = [1, 1]} : vector<256x32xf32> to vector<64x32xf32>
    %16 = tpu.concatenate %12, %13, %14, %15 in 1 : vector<64x32xf32>, vector<64x32xf32>, vector<64x32xf32>, vector<64x32xf32> -> vector<64x128xf32>
    %c0_8 = arith.constant 0 : index
    %c0_9 = arith.constant 0 : index
    %17 = vector.load %arg3[%c0_8, %c0_9] : memref<128x64xf32, #tpu.memory_space<vmem>>, vector<128x64xf32>
    %cst_10 = arith.constant dense<0.000000e+00> : vector<64x64xf32>
    %18 = tpu.matmul %16, %17, %cst_10 {dimension_numbers = #tpu.dot_dimension_numbers<[1], [0], [0], [1], [0, 0, 1, 1], [], []>} : vector<64x128xf32>, vector<128x64xf32>, vector<64x64xf32> -> vector<64x64xf32>
    %c0_11 = arith.constant 0 : index
    %c0_12 = arith.constant 0 : index
    %19 = vector.load %arg8[%c0_11, %c0_12] : memref<1x64xf32, #tpu.memory_space<vmem>>, vector<1x64xf32>
    %20 = vector.broadcast %19 : vector<1x64xf32> to vector<64x64xf32>
    %21 = arith.addf %18, %20 : vector<64x64xf32>
    %cst_13 = arith.constant 0.000000e+00 : f32
    %22 = vector.broadcast %cst_13 : f32 to vector<64x64xf32>
    %23 = arith.cmpf oge, %21, %22 : vector<64x64xf32>
    %cst_14 = arith.constant 2.000000e-01 : f32
    %24 = vector.broadcast %cst_14 : f32 to vector<64x64xf32>
    %25 = arith.mulf %24, %21 : vector<64x64xf32>
    %26 = arith.select %23, %21, %25 : vector<64x64xi1>, vector<64x64xf32>
    %27 = vector.extract_strided_slice %26 {offsets = [0, 0], sizes = [16, 64], strides = [1, 1]} : vector<64x64xf32> to vector<16x64xf32>
    %28 = vector.extract_strided_slice %26 {offsets = [16, 0], sizes = [16, 64], strides = [1, 1]} : vector<64x64xf32> to vector<16x64xf32>
    %29 = vector.extract_strided_slice %26 {offsets = [32, 0], sizes = [16, 64], strides = [1, 1]} : vector<64x64xf32> to vector<16x64xf32>
    %30 = vector.extract_strided_slice %26 {offsets = [48, 0], sizes = [16, 64], strides = [1, 1]} : vector<64x64xf32> to vector<16x64xf32>
    %31 = tpu.concatenate %27, %28, %29, %30 in 1 : vector<16x64xf32>, vector<16x64xf32>, vector<16x64xf32>, vector<16x64xf32> -> vector<16x256xf32>
    %c0_15 = arith.constant 0 : index
    %c0_16 = arith.constant 0 : index
    %32 = vector.load %arg4[%c0_15, %c0_16] : memref<256x128xf32, #tpu.memory_space<vmem>>, vector<256x128xf32>
    %cst_17 = arith.constant dense<0.000000e+00> : vector<16x128xf32>
    %33 = tpu.matmul %31, %32, %cst_17 {dimension_numbers = #tpu.dot_dimension_numbers<[1], [0], [0], [1], [0, 0, 1, 1], [], []>} : vector<16x256xf32>, vector<256x128xf32>, vector<16x128xf32> -> vector<16x128xf32>
    %c0_18 = arith.constant 0 : index
    %c0_19 = arith.constant 0 : index
    %34 = vector.load %arg9[%c0_18, %c0_19] : memref<1x128xf32, #tpu.memory_space<vmem>>, vector<1x128xf32>
    %35 = vector.broadcast %34 : vector<1x128xf32> to vector<16x128xf32>
    %36 = arith.addf %33, %35 : vector<16x128xf32>
    %cst_20 = arith.constant 0.000000e+00 : f32
    %37 = vector.broadcast %cst_20 : f32 to vector<16x128xf32>
    %38 = arith.cmpf oge, %36, %37 : vector<16x128xf32>
    %cst_21 = arith.constant 2.000000e-01 : f32
    %39 = vector.broadcast %cst_21 : f32 to vector<16x128xf32>
    %40 = arith.mulf %39, %36 : vector<16x128xf32>
    %41 = arith.select %38, %36, %40 : vector<16x128xi1>, vector<16x128xf32>
    %42 = vector.extract_strided_slice %41 {offsets = [0, 0], sizes = [4, 128], strides = [1, 1]} : vector<16x128xf32> to vector<4x128xf32>
    %43 = vector.extract_strided_slice %41 {offsets = [4, 0], sizes = [4, 128], strides = [1, 1]} : vector<16x128xf32> to vector<4x128xf32>
    %44 = vector.extract_strided_slice %41 {offsets = [8, 0], sizes = [4, 128], strides = [1, 1]} : vector<16x128xf32> to vector<4x128xf32>
    %45 = vector.extract_strided_slice %41 {offsets = [12, 0], sizes = [4, 128], strides = [1, 1]} : vector<16x128xf32> to vector<4x128xf32>
    %46 = tpu.concatenate %42, %43, %44, %45 in 1 : vector<4x128xf32>, vector<4x128xf32>, vector<4x128xf32>, vector<4x128xf32> -> vector<4x512xf32>
    %c0_22 = arith.constant 0 : index
    %c0_23 = arith.constant 0 : index
    %47 = vector.load %arg5[%c0_22, %c0_23] : memref<512x256xf32, #tpu.memory_space<vmem>>, vector<512x256xf32>
    %cst_24 = arith.constant dense<0.000000e+00> : vector<4x256xf32>
    %48 = tpu.matmul %46, %47, %cst_24 {dimension_numbers = #tpu.dot_dimension_numbers<[1], [0], [0], [1], [0, 0, 1, 1], [], []>} : vector<4x512xf32>, vector<512x256xf32>, vector<4x256xf32> -> vector<4x256xf32>
    %c0_25 = arith.constant 0 : index
    %c0_26 = arith.constant 0 : index
    %49 = vector.load %arg10[%c0_25, %c0_26] : memref<1x256xf32, #tpu.memory_space<vmem>>, vector<1x256xf32>
    %50 = vector.broadcast %49 : vector<1x256xf32> to vector<4x256xf32>
    %51 = arith.addf %48, %50 : vector<4x256xf32>
    %cst_27 = arith.constant 0.000000e+00 : f32
    %52 = vector.broadcast %cst_27 : f32 to vector<4x256xf32>
    %53 = arith.cmpf oge, %51, %52 : vector<4x256xf32>
    %cst_28 = arith.constant 2.000000e-01 : f32
    %54 = vector.broadcast %cst_28 : f32 to vector<4x256xf32>
    %55 = arith.mulf %54, %51 : vector<4x256xf32>
    %56 = arith.select %53, %51, %55 : vector<4x256xi1>, vector<4x256xf32>
    %57 = vector.extract_strided_slice %56 {offsets = [0, 0], sizes = [1, 256], strides = [1, 1]} : vector<4x256xf32> to vector<1x256xf32>
    %58 = vector.extract_strided_slice %56 {offsets = [1, 0], sizes = [1, 256], strides = [1, 1]} : vector<4x256xf32> to vector<1x256xf32>
    %59 = vector.extract_strided_slice %56 {offsets = [2, 0], sizes = [1, 256], strides = [1, 1]} : vector<4x256xf32> to vector<1x256xf32>
    %60 = vector.extract_strided_slice %56 {offsets = [3, 0], sizes = [1, 256], strides = [1, 1]} : vector<4x256xf32> to vector<1x256xf32>
    %61 = tpu.concatenate %57, %58, %59, %60 in 1 : vector<1x256xf32>, vector<1x256xf32>, vector<1x256xf32>, vector<1x256xf32> -> vector<1x1024xf32>
    %c0_29 = arith.constant 0 : index
    %c0_30 = arith.constant 0 : index
    %62 = vector.load %arg6[%c0_29, %c0_30] : memref<1x1024xf32, #tpu.memory_space<vmem>>, vector<1x1024xf32>
    %63 = arith.mulf %61, %62 : vector<1x1024xf32>
    %cst_31 = arith.constant dense<0.000000e+00> : vector<1xf32>
    %64 = vector.multi_reduction <add>, %63, %cst_31 [1] : vector<1x1024xf32> to vector<1xf32>
    %65 = vector.shape_cast %64 : vector<1xf32> to vector<1x1xf32>
    %c0_32 = arith.constant 0 : index
    %c0_33 = arith.constant 0 : index
    %66 = vector.load %arg11[%c0_32, %c0_33] : memref<1x1xf32, #tpu.memory_space<vmem>>, vector<1x1xf32>
    %67 = arith.addf %65, %66 : vector<1x1xf32>
    %cst_34 = arith.constant 0.000000e+00 : f32
    %68 = vector.broadcast %cst_34 : f32 to vector<1x1xf32>
    %69 = arith.subf %68, %67 : vector<1x1xf32>
    %70 = math.exp %69 : vector<1x1xf32>
    %cst_35 = arith.constant 1.000000e+00 : f32
    %71 = vector.broadcast %cst_35 : f32 to vector<1x1xf32>
    %72 = arith.addf %71, %70 : vector<1x1xf32>
    %73 = tpu.reciprocal %72 {approx = true} : vector<1x1xf32> -> vector<1x1xf32>
    %c0_36 = arith.constant 0 : index
    %c0_37 = arith.constant 0 : index
    %c0_38 = arith.constant 0 : index
    %74 = vector.load %arg12[%c0_36, %c0_37, %c0_38] : memref<1x1x1xf32, #tpu.memory_space<vmem>>, vector<1x1x1xf32>
    %75 = vector.shape_cast %74 : vector<1x1x1xf32> to vector<1x1xf32>
    %76 = vector.shape_cast %73 : vector<1x1xf32> to vector<1x1x1xf32>
    tpu.vector_store %arg12[%c0_36, %c0_37, %c0_38], %76 {strides = array<i32>} : memref<1x1x1xf32, #tpu.memory_space<vmem>>, vector<1x1x1xf32>,
    return
  }
  func.func @transform_0(%arg0: i32) -> (i32, i32, i32) {
    %c0_i32 = arith.constant 0 : i32
    %c0_i32_0 = arith.constant 0 : i32
    %c0_i32_1 = arith.constant 0 : i32
    return %arg0, %c0_i32, %c0_i32_0 : i32, i32, i32
  }
  func.func @transform_1(%arg0: i32) -> (i32, i32) {
    %c0_i32 = arith.constant 0 : i32
    %c0_i32_0 = arith.constant 0 : i32
    %c0_i32_1 = arith.constant 0 : i32
    return %c0_i32, %c0_i32_0 : i32, i32
  }
  func.func @transform_2(%arg0: i32) -> (i32, i32) {
    %c0_i32 = arith.constant 0 : i32
    %c0_i32_0 = arith.constant 0 : i32
    %c0_i32_1 = arith.constant 0 : i32
    return %c0_i32, %c0_i32_0 : i32, i32
  }
  func.func @transform_3(%arg0: i32) -> (i32, i32) {
    %c0_i32 = arith.constant 0 : i32
    %c0_i32_0 = arith.constant 0 : i32
    %c0_i32_1 = arith.constant 0 : i32
    return %c0_i32, %c0_i32_0 : i32, i32
  }
  func.func @transform_4(%arg0: i32) -> (i32, i32) {
    %c0_i32 = arith.constant 0 : i32
    %c0_i32_0 = arith.constant 0 : i32
    %c0_i32_1 = arith.constant 0 : i32
    return %c0_i32, %c0_i32_0 : i32, i32
  }
  func.func @transform_5(%arg0: i32) -> (i32, i32) {
    %c0_i32 = arith.constant 0 : i32
    %c0_i32_0 = arith.constant 0 : i32
    %c0_i32_1 = arith.constant 0 : i32
    return %c0_i32, %c0_i32_0 : i32, i32
  }
  func.func @transform_6(%arg0: i32) -> (i32, i32) {
    %c0_i32 = arith.constant 0 : i32
    %c0_i32_0 = arith.constant 0 : i32
    %c0_i32_1 = arith.constant 0 : i32
    return %c0_i32, %c0_i32_0 : i32, i32
  }
  func.func @transform_7(%arg0: i32) -> (i32, i32) {
    %c0_i32 = arith.constant 0 : i32
    %c0_i32_0 = arith.constant 0 : i32
    %c0_i32_1 = arith.constant 0 : i32
    return %c0_i32, %c0_i32_0 : i32, i32
  }
  func.func @transform_8(%arg0: i32) -> (i32, i32) {
    %c0_i32 = arith.constant 0 : i32
    %c0_i32_0 = arith.constant 0 : i32
    %c0_i32_1 = arith.constant 0 : i32
    return %c0_i32, %c0_i32_0 : i32, i32
  }
  func.func @transform_9(%arg0: i32) -> (i32, i32) {
    %c0_i32 = arith.constant 0 : i32
    %c0_i32_0 = arith.constant 0 : i32
    %c0_i32_1 = arith.constant 0 : i32
    return %c0_i32, %c0_i32_0 : i32, i32
  }
  func.func @transform_10(%arg0: i32) -> (i32, i32) {
    %c0_i32 = arith.constant 0 : i32
    %c0_i32_0 = arith.constant 0 : i32
    %c0_i32_1 = arith.constant 0 : i32
    return %c0_i32, %c0_i32_0 : i32, i32
  }
  func.func @transform_11(%arg0: i32) -> (i32, i32, i32) {
    %c0_i32 = arith.constant 0 : i32
    %c0_i32_0 = arith.constant 0 : i32
    %c0_i32_1 = arith.constant 0 : i32
    return %arg0, %c0_i32, %c0_i32_0 : i32, i32, i32
  }
}

</mosaic_0001>

<bundles_post_ra>
// kernel: discriminator_image_forward.1
= control target key start
LH: loop header
LB: loop body
LE: loop exit
PB: predicated region body
PF: predicated region fallthrough
CT: control target
= control target key end

     0   :  { %s2296_s19 = smov 0   ;;  %s3097_s0 = inlined_call_operand.vmem [shape: f32[4,256,12], index: 0, kind: input, shape index: {}]   ;;  %s3098_s1 = inlined_call_operand.vmem [shape: f32[12,32], index: 1, kind: input, shape index: {}]   ;;  %s3099_s2 = inlined_call_operand.vmem [shape: f32[128,64], index: 2, kind: input, shape index: {}]   ;;  %s3100_s3 = inlined_call_operand.vmem [shape: f32[256,128], index: 3, kind: input, shape index: {}]   ;;  %s3101_s4 = inlined_call_operand.vmem [shape: f32[512,256], index: 4, kind: input, shape index: {}]   ;;  %s3102_s5 = inlined_call_operand.vmem [shape: f32[1,1024], index: 5, kind: input, shape index: {}]   ;;  %s3103_s6 = inlined_call_operand.vmem [shape: f32[1,32], index: 6, kind: input, shape index: {}]   ;;  %s3104_s7 = inlined_call_operand.vmem [shape: f32[1,64], index: 7, kind: input, shape index: {}]   ;;  %s3105_s8 = inlined_call_operand.vmem [shape: f32[1,128], index: 8, kind: input, shape index: {}]   ;;  %s3106_s9 = inlined_call_operand.vmem [shape: f32[1,256], index: 9, kind: input, shape index: {}]   ;;  %s3107_s10 = inlined_call_operand.<no memory space> [shape: f32[1,1], index: 10, kind: input, shape index: {}]   ;;  %s3108_s11 = inlined_call_operand.vmem [shape: f32[4,1,1], index: 11, kind: output, shape index: {}]  }
   0x1   :  { %v16_v0 = vstv %s3107_s10 }
   0x2   :  { %17 = vst [vmem:[#allocation2] sm:$0x1] %v16_v0 }
   0x3 LB: > { %s1695_s20 = sadd.s32 4294967295, %s2227_s19   ;;  %p1699_p0 = scmp.ge.s32.totalorder %s2227_s19, 1  ;;  %s2227_s19 = sphi %s2296_s19, %s23_s19  }
   0x4   : > { %p339_p1 = scmp.lt.s32.totalorder %s2227_s19, 5 }
   0x6   : > { %p340_p2 = pnand %p1699_p0, %p339_p1 }
   0x7   : > { %v417_v1 = vld [vmem:[%s3098_s1] sm:$0xff] (!%p340_p2)  ;;  %v418_v2 = vld [vmem:[%s3098_s1 + $0x8] sm:$0xf] (!%p340_p2)  ;;  %vm523_vm0 = vcmask (!%p340_p2), 1043456   ;;  %p377_p3 = scmp.lt.s32.totalorder (!%p340_p2), %s1695_s20, 3  ;;  %vm2229_vm1 = vmmov (!%p340_p2), 1  }
   0x8   : > { %343 = sbr.rel (%p340_p2) target bundleno = 1454 (0x5ae), region = 64  ;;  %v1933_v3 = vpack.c.bf16 (!%p340_p2), %v418_v2, %v417_v1  ;;  %vm1934_vm2 = vmpackc.low (!%p340_p2), %vm523_vm0, %vm2229_vm1  ;;  %vm426_vm3 = vcmask (!%p340_p2), 97280   ;;  %v971_v36 = vld [vmem:[%s3099_s2] sm:$0xff] (!%p340_p2)  ;;  %v972_v37 = vld [vmem:[%s3099_s2 + $0x8] sm:$0xff] (!%p340_p2)  ;;  %s2230_s17 = smov (!%p340_p2), 32  }
   0x9   : > { %v973_v38 = vld [vmem:[%s3099_s2 + $0x10] sm:$0xff] (!%p340_p2)  ;;  %v1939_v39 = vpack.c.bf16 (!%p340_p2), %v972_v37, %v971_v36  ;;  %v974_v40 = vld [vmem:[%s3099_s2 + $0x18] sm:$0xff] (!%p340_p2)  ;;  %v975_v42 = vld [vmem:[%s3099_s2 + $0x20] sm:$0xff] (!%p340_p2)  ;;  %s2232_s28 = smov (!%p340_p2), 96  }
   0xa   : > { %1935 = vmatprep.subr.msk.bf16.mxu1 (!%p340_p2), %vm1934_vm2, %v1933_v3  ;;  %v1943_v41 = vpack.c.bf16 (!%p340_p2), %v974_v40, %v973_v38  ;;  %v976_v43 = vld [vmem:[%s3099_s2 + $0x28] sm:$0xff] (!%p340_p2)  ;;  %v977_v45 = vld [vmem:[%s3099_s2 + $0x30] sm:$0xff] (!%p340_p2)  ;;  %v978_v46 = vld [vmem:[%s3099_s2 + $0x38] sm:$0xff] (!%p340_p2) }
   0xb   : > { %1938 = vmatpush3.bf16.msk.msra.mxu1 (!%p340_p2), %vm1934_vm2, %v1933_v3  ;;  %v1947_v44 = vpack.c.bf16 (!%p340_p2), %v976_v43, %v975_v42  ;;  %v1951_v47 = vpack.c.bf16 (!%p340_p2), %v978_v46, %v977_v45  ;;  %v2409_v48 = vld [vmem:[%s3103_s6] ss:$0 sm:$0xff] (!%p340_p2)  ;;  %v980_v3 = vld [vmem:[%s3099_s2 + $0x48] sm:$0xff] (!%p340_p2) }
   0xc   : > { %1940 = vmatprep.subr.bf16.mxu1 (!%p340_p2), %v1939_v39  ;;  %v979_v2 = vld [vmem:[%s3099_s2 + $0x40] sm:$0xff] (!%p340_p2)  ;;  %v984_v42 = vld [vmem:[%s3099_s2 + $0x68] sm:$0xff] (!%p340_p2) }
   0xf   : > { %s3110_s20 = smov (!%p377_p3, %s1695_s20), 3 }
  0x10   : > { %s1740_s24 = sshll.u32 %s3110_s20, 8  ;;  %s384_s22 = scalar_lea.vmem %s3108_s11, %s3110_s20 }
  0x11   : > { %s2316_s27 = scalar_lea.vmem %s3097_s0, %s1740_s24 }
  0x12   : > { %v385_v4 = vld [vmem:[%s2316_s27] sm:$0xff]  ;;  %v386_v5 = vld [vmem:[%s2316_s27 + $0x8] sm:$0xff]  ;;  %v387_v6 = vld [vmem:[%s2316_s27 + $0x10] sm:$0xff] }
  0x13   : > { %1841 = vmatprep.mubr.msk.f32.mxu1 %vm426_vm3, %v385_v4  ;;  %v388_v7 = vld [vmem:[%s2316_s27 + $0x18] sm:$0xff]  ;;  %v389_v8 = vld [vmem:[%s2316_s27 + $0x20] sm:$0xff]  ;;  %v390_v9 = vld [vmem:[%s2316_s27 + $0x28] sm:$0xff] }
  0x14   : > { %1842 = vmatmul.mubr.msk.f32.vlgmr.msra.gmra.mrb[0].mxu1 %vm426_vm3, %v386_v5  ;;  %v391_v10 = vld [vmem:[%s2316_s27 + $0x30] sm:$0xff]  ;;  %v392_v11 = vld [vmem:[%s2316_s27 + $0x38] sm:$0xff]  ;;  %v393_v12 = vld [vmem:[%s2316_s27 + $0x40] sm:$0xff] }
  0x15   : > { %1844 = vmatprep.mubr.msk.f32.mxu1 %vm426_vm3, %v387_v6  ;;  %v394_v13 = vld [vmem:[%s2316_s27 + $0x48] sm:$0xff]  ;;  %v395_v14 = vld [vmem:[%s2316_s27 + $0x50] sm:$0xff]  ;;  %v396_v15 = vld [vmem:[%s2316_s27 + $0x58] sm:$0xff]  ;;  %1942 = vmatpush3.bf16.msra.mxu1 %v1939_v39  ;;  %v1955_v6 = vpack.c.bf16 %v980_v3, %v979_v2 }
  0x16   : > { %v397_v16 = vld [vmem:[%s2316_s27 + $0x60] sm:$0xff]  ;;  %v398_v17 = vld [vmem:[%s2316_s27 + $0x68] sm:$0xff]  ;;  %v399_v18 = vld [vmem:[%s2316_s27 + $0x70] sm:$0xff]  ;;  %1944 = vmatprep.subr.bf16.mxu1 %v1943_v41 }
  0x17   : > { %v400_v19 = vld [vmem:[%s2316_s27 + $0x78] sm:$0xff]  ;;  %v401_v20 = vld [vmem:[%s2316_s27 + $0x80] sm:$0xff]  ;;  %v402_v21 = vld [vmem:[%s2316_s27 + $0x88] sm:$0xff] }
  0x18   : > { %1845 = vmatmul.mubr.msk.f32.gmra.mrb[2].mxu1 %vm426_vm3, %v388_v7  ;;  %v403_v22 = vld [vmem:[%s2316_s27 + $0x90] sm:$0xff]  ;;  %v404_v23 = vld [vmem:[%s2316_s27 + $0x98] sm:$0xff]  ;;  %v405_v24 = vld [vmem:[%s2316_s27 + $0xa0] sm:$0xff] }
  0x19   : > { %1847 = vmatprep.mubr.msk.f32.mxu1 %vm426_vm3, %v389_v8  ;;  %v406_v25 = vld [vmem:[%s2316_s27 + $0xa8] sm:$0xff]  ;;  %v407_v26 = vld [vmem:[%s2316_s27 + $0xb0] sm:$0xff]  ;;  %v408_v27 = vld [vmem:[%s2316_s27 + $0xb8] sm:$0xff]  ;;  %1946 = vmatpush3.bf16.msra.mxu1 %v1943_v41 }
  0x1a   : > { %v409_v28 = vld [vmem:[%s2316_s27 + $0xc0] sm:$0xff]  ;;  %v410_v29 = vld [vmem:[%s2316_s27 + $0xc8] sm:$0xff]  ;;  %v411_v30 = vld [vmem:[%s2316_s27 + $0xd0] sm:$0xff]  ;;  %1948 = vmatprep.subr.bf16.mxu1 %v1947_v44 }
  0x1b   : > { %v412_v31 = vld [vmem:[%s2316_s27 + $0xd8] sm:$0xff]  ;;  %v413_v32 = vld [vmem:[%s2316_s27 + $0xe0] sm:$0xff]  ;;  %v414_v33 = vld [vmem:[%s2316_s27 + $0xe8] sm:$0xff] }
  0x1c   : > { %1848 = vmatmul.mubr.msk.f32.gmra.mrb[4].mxu1 %vm426_vm3, %v390_v9  ;;  %v415_v34 = vld [vmem:[%s2316_s27 + $0xf0] sm:$0xff]  ;;  %v416_v35 = vld [vmem:[%s2316_s27 + $0xf8] sm:$0xff]  ;;  %v983_v41 = vld [vmem:[%s3099_s2 + $0x60] sm:$0xff]  ;;  %s2231_s27 = smov 64  }
  0x1d   : > { %1850 = vmatprep.mubr.msk.f32.mxu1 %vm426_vm3, %v391_v10  ;;  %1950 = vmatpush3.bf16.msra.mxu1 %v1947_v44  ;;  %v1963_v46 = vpack.c.bf16 %v984_v42, %v983_v41 }
  0x1e   : > { %1952 = vmatprep.subr.bf16.mxu1 %v1951_v47 }
  0x20   : > { %1851 = vmatmul.mubr.msk.f32.gmra.mrb[6].mxu1 %vm426_vm3, %v392_v11  ;;  %v981_v11 = vld [vmem:[%s3099_s2 + $0x50] sm:$0xff] }
  0x21   : > { %1853 = vmatprep.mubr.msk.f32.mxu1 %vm426_vm3, %v393_v12  ;;  %1954 = vmatpush3.bf16.msra.mxu1 %v1951_v47  ;;  %v982_v12 = vld [vmem:[%s3099_s2 + $0x58] sm:$0xff] }
  0x22   : > { %1956 = vmatprep.subr.bf16.mxu1 %v1955_v6 }
  0x24   : > { %1854 = vmatmul.mubr.msk.f32.gmra.mrb[8].mxu1 %vm426_vm3, %v394_v13 }
  0x25   : > { %1856 = vmatprep.mubr.msk.f32.mxu1 %vm426_vm3, %v395_v14  ;;  %1958 = vmatpush3.bf16.msra.mxu1 %v1955_v6 }
  0x28   : > { %1857 = vmatmul.mubr.msk.f32.gmra.mrb[10].mxu1 %vm426_vm3, %v396_v15 }
  0x29   : > { %1859 = vmatprep.mubr.msk.f32.mxu1 %vm426_vm3, %v397_v16  ;;  %v1959_v16 = vpack.c.bf16 %v982_v12, %v981_v11 }
  0x2b   : > { %1960 = vmatprep.subr.bf16.mxu1 %v1959_v16 }
  0x2c   : > { %1860 = vmatmul.mubr.msk.f32.gmra.mrb[12].mxu1 %vm426_vm3, %v398_v17 }
  0x2d   : > { %1862 = vmatprep.mubr.msk.f32.mxu1 %vm426_vm3, %v399_v18  ;;  %1962 = vmatpush3.bf16.msra.mxu1 %v1959_v16 }
  0x2e   : > { %1964 = vmatprep.subr.bf16.mxu1 %v1963_v46 }
  0x30   : > { %1863 = vmatmul.mubr.msk.f32.gmra.mrb[14].mxu1 %vm426_vm3, %v400_v19 }
  0x31   : > { %1865 = vmatprep.mubr.msk.f32.mxu1 %vm426_vm3, %v401_v20  ;;  %1966 = vmatpush3.bf16.msra.mxu1 %v1963_v46 }
  0x34   : > { %1866 = vmatmul.mubr.msk.f32.gmra.mrb[16].mxu1 %vm426_vm3, %v402_v21 }
  0x35   : > { %1868 = vmatprep.mubr.msk.f32.mxu1 %vm426_vm3, %v403_v22 }
  0x38   : > { %1869 = vmatmul.mubr.msk.f32.gmra.mrb[18].mxu1 %vm426_vm3, %v404_v23 }
  0x39   : > { %1871 = vmatprep.mubr.msk.f32.mxu1 %vm426_vm3, %v405_v24 }
  0x3c   : > { %1872 = vmatmul.mubr.msk.f32.gmra.mrb[20].mxu1 %vm426_vm3, %v406_v25 }
  0x3d   : > { %1874 = vmatprep.mubr.msk.f32.mxu1 %vm426_vm3, %v407_v26 }
  0x40   : > { %1875 = vmatmul.mubr.msk.f32.gmra.mrb[22].mxu1 %vm426_vm3, %v408_v27 }
  0x41   : > { %1877 = vmatprep.mubr.msk.f32.mxu1 %vm426_vm3, %v409_v28 }
  0x44   : > { %1878 = vmatmul.mubr.msk.f32.gmra.mrb[24].mxu1 %vm426_vm3, %v410_v29 }
  0x45   : > { %1880 = vmatprep.mubr.msk.f32.mxu1 %vm426_vm3, %v411_v30 }
  0x48   : > { %1881 = vmatmul.mubr.msk.f32.gmra.mrb[26].mxu1 %vm426_vm3, %v412_v31 }
  0x49   : > { %1883 = vmatprep.mubr.msk.f32.mxu1 %vm426_vm3, %v413_v32 }
  0x4c   : > { %1884 = vmatmul.mubr.msk.f32.gmra.mrb[28].mxu1 %vm426_vm3, %v414_v33 }
  0x4d   : > { %1886 = vmatprep.mubr.msk.f32.mxu1 %vm426_vm3, %v415_v34 }
  0x50   : > { %1887 = vmatmul.mubr.msk.f32.gmra.mrb[30].mxu1 %vm426_vm3, %v416_v35 }
  0xe7   : > { %v1843_v49 = vpop.f32.mrb[0].mxu1 }
  0xe8   : > { %v2412_v50 = vadd.f32 %v1843_v49, %v2409_v48  ;;  %v593_v51 = vpop.f32.mrb[1].mxu1 }
  0xe9   : > { %v2415_v52 = vadd.f32 %v2409_v48, %v593_v51 }
  0xeb   : > { %v1846_v53 = vpop.f32.mrb[2].mxu1 }
  0xec   : > { %v2418_v54 = vadd.f32 %v1846_v53, %v2409_v48  ;;  %v603_v55 = vpop.f32.mrb[3].mxu1 }
  0xed   : > { %v2421_v56 = vadd.f32 %v2409_v48, %v603_v55 }
  0xef   : > { %v1849_v57 = vpop.f32.mrb[4].mxu1 }
  0xf0   : > { %v2424_v58 = vadd.f32 %v1849_v57, %v2409_v48  ;;  %v613_v59 = vpop.f32.mrb[5].mxu1 }
  0xf1   : > { %v2427_v60 = vadd.f32 %v2409_v48, %v613_v59  ;;  %v985_v59 = vld [vmem:[%s3099_s2 + $0x70] sm:$0xff] }
  0xf3   : > { %v1852_v61 = vpop.f32.mrb[6].mxu1 }
  0xf4   : > { %v2430_v62 = vadd.f32 %v1852_v61, %v2409_v48  ;;  %v623_v63 = vpop.f32.mrb[7].mxu1  ;;  %v986_v61 = vld [vmem:[%s3099_s2 + $0x78] sm:$0xff] }
  0xf5   : > { %v2433_v0 = vadd.f32 %v2409_v48, %v623_v63  ;;  %v1967_v3 = vpack.c.bf16 %v986_v61, %v985_v59 }
  0xf7   : > { %v1855_v1 = vpop.f32.mrb[8].mxu1  ;;  %1968 = vmatprep.subr.bf16.mxu1 %v1967_v3 }
  0xf8   : > { %v639_v4 = vadd.f32 %v1855_v1, %v2409_v48  ;;  %v633_v5 = vpop.f32.mrb[9].mxu1  ;;  %1970 = vmatpush3.bf16.msra.mxu1 %v1967_v3 }
  0xf9   : > { %v634_v7 = vadd.f32 %v2409_v48, %v633_v5 }
  0xfa   : > { %v793_v8 = vmul.f32 0.2, %v639_v4  ;;  %vm761_vm4 = vcmp.ge.f32.partialorder %v639_v4, 0.0 }
  0xfb   : > { %v792_v9 = vmul.f32 0.2, %v634_v7  ;;  %v1858_v10 = vpop.f32.mrb[10].mxu1  ;;  %vm760_vm5 = vcmp.ge.f32.partialorder %v634_v7, 0.0 }
  0xfc   : > { %v649_v13 = vadd.f32 %v1858_v10, %v2409_v48  ;;  %v643_v14 = vpop.f32.mrb[11].mxu1  ;;  %v825_v15 = vsel %vm761_vm4, %v639_v4, %v793_v8 }
  0xfd   : > { %v644_v17 = vadd.f32 %v2409_v48, %v643_v14  ;;  %v824_v18 = vsel %vm760_vm5, %v634_v7, %v792_v9 }
  0xfe   : > { %v795_v19 = vmul.f32 0.2, %v649_v13  ;;  %v2147_v20 = vpack.i.bf16 %v825_v15, %v824_v18  ;;  %vm763_vm6 = vcmp.ge.f32.partialorder %v649_v13, 0.0 }
  0xff   : > { %v794_v21 = vmul.f32 0.2, %v644_v17  ;;  %v1861_v22 = vpop.f32.mrb[12].mxu1  ;;  %vm762_vm7 = vcmp.ge.f32.partialorder %v644_v17, 0.0 }
 0x100   : > { %v659_v23 = vadd.f32 %v1861_v22, %v2409_v48  ;;  %v653_v24 = vpop.f32.mrb[13].mxu1  ;;  %2148 = vrot.lane.b32.xlu0 %v2147_v20, %s2230_s17  ;;  %v827_v25 = vsel %vm763_vm6, %v649_v13, %v795_v19 }
 0x101   : > { %v654_v26 = vadd.f32 %v2409_v48, %v653_v24  ;;  %v826_v27 = vsel %vm762_vm7, %v644_v17, %v794_v21 }
 0x102   : > { %vm765_vm8 = vcmp.ge.f32.partialorder %v659_v23, 0.0  ;;  %v797_v28 = vmul.f32 0.2, %v659_v23  ;;  %v2152_v29 = vpack.i.bf16 %v827_v25, %v826_v27 }
 0x103   : > { %vm764_vm9 = vcmp.ge.f32.partialorder %v654_v26, 0.0  ;;  %v796_v30 = vmul.f32 0.2, %v654_v26  ;;  %v1864_v31 = vpop.f32.mrb[14].mxu1 }
 0x104   : > { %v669_v32 = vadd.f32 %v1864_v31, %v2409_v48  ;;  %v663_v33 = vpop.f32.mrb[15].mxu1  ;;  %2153 = vrot.lane.b32.xlu1 %v2152_v29, %s2230_s17  ;;  %v829_v34 = vsel %vm765_vm8, %v659_v23, %v797_v28 }
 0x105   : > { %v664_v35 = vadd.f32 %v2409_v48, %v663_v33  ;;  %v828_v36 = vsel %vm764_vm9, %v654_v26, %v796_v30 }
 0x106   : > { %vm767_vm10 = vcmp.ge.f32.partialorder %v669_v32, 0.0  ;;  %v799_v37 = vmul.f32 0.2, %v669_v32  ;;  %v2157_v38 = vpack.i.bf16 %v829_v34, %v828_v36 }
 0x107   : > { %vm766_vm11 = vcmp.ge.f32.partialorder %v664_v35, 0.0  ;;  %v798_v39 = vmul.f32 0.2, %v664_v35  ;;  %v1867_v40 = vpop.f32.mrb[16].mxu1 }
 0x108   : > { %v679_v43 = vadd.f32 %v1867_v40, %v2409_v48  ;;  %v673_v44 = vpop.f32.mrb[17].mxu1  ;;  %2158 = vrot.lane.b32.xlu0 %v2157_v38, %s2230_s17  ;;  %v2465_v45 = vsel %vm767_vm10, %v669_v32, %v799_v37 }
 0x109   : > { %v674_v47 = vadd.f32 %v2409_v48, %v673_v44  ;;  %v2468_v49 = vsel %vm766_vm11, %v664_v35, %v798_v39 }
 0x10a   : > { %vm769_vm12 = vcmp.ge.f32.partialorder %v679_v43, 0.0  ;;  %v801_v51 = vmul.f32 0.2, %v679_v43  ;;  %v2187_v53 = vpack.i.bf16 %v2465_v45, %v2468_v49  ;;  %v786_v45 = vmul.f32 0.2, %v2421_v56 }
 0x10b   : > { %vm768_vm13 = vcmp.ge.f32.partialorder %v674_v47, 0.0  ;;  %v800_v55 = vmul.f32 0.2, %v674_v47  ;;  %v1870_v57 = vpop.f32.mrb[18].mxu1 }
 0x10c   : > { %v689_v63 = vadd.f32 %v1870_v57, %v2409_v48  ;;  %v683_v1 = vpop.f32.mrb[19].mxu1  ;;  %v833_v2 = vsel %vm769_vm12, %v679_v43, %v801_v51  ;;  %vm753_vm12 = vcmp.ge.f32.partialorder %v2412_v50, 0.0 }
 0x10d   : > { %v684_v4 = vadd.f32 %v2409_v48, %v683_v1  ;;  %v832_v5 = vsel %vm768_vm13, %v674_v47, %v800_v55  ;;  %vm752_vm13 = vcmp.ge.f32.partialorder %v2415_v52, 0.0 }
 0x10e   : > { %vm771_vm14 = vcmp.ge.f32.partialorder %v689_v63, 0.0  ;;  %v803_v6 = vmul.f32 0.2, %v689_v63  ;;  %v2162_v7 = vpack.i.bf16 %v833_v2, %v832_v5 }
 0x10f   : > { %vm770_vm15 = vcmp.ge.f32.partialorder %v684_v4, 0.0  ;;  %v802_v8 = vmul.f32 0.2, %v684_v4  ;;  %v1873_v9 = vpop.f32.mrb[20].mxu1 }
 0x110   : > { %v699_v10 = vadd.f32 %v1873_v9, %v2409_v48  ;;  %v693_v11 = vpop.f32.mrb[21].mxu1  ;;  %2163 = vrot.lane.b32.xlu0 %v2162_v7, %s2231_s27  ;;  %v835_v12 = vsel %vm771_vm14, %v689_v63, %v803_v6  ;;  %vm755_vm14 = vcmp.ge.f32.partialorder %v2418_v54, 0.0 }
 0x111   : > { %v694_v13 = vadd.f32 %v2409_v48, %v693_v11  ;;  %v834_v14 = vsel %vm770_vm15, %v684_v4, %v802_v8  ;;  %vm754_vm15 = vcmp.ge.f32.partialorder %v2421_v56, 0.0 }
 0x112   : > { %vm773_vm0 = vcmp.ge.f32.partialorder %v699_v10, 0.0  ;;  %v805_v15 = vmul.f32 0.2, %v699_v10  ;;  %v2167_v16 = vpack.i.bf16 %v835_v12, %v834_v14 }
 0x113   : > { %vm772_vm1 = vcmp.ge.f32.partialorder %v694_v13, 0.0  ;;  %v804_v17 = vmul.f32 0.2, %v694_v13  ;;  %v1876_v18 = vpop.f32.mrb[22].mxu1 }
 0x114   : > { %v709_v19 = vadd.f32 %v1876_v18, %v2409_v48  ;;  %v703_v20 = vpop.f32.mrb[23].mxu1  ;;  %2168 = vrot.lane.b32.xlu0 %v2167_v16, %s2231_s27  ;;  %v837_v21 = vsel %vm773_vm0, %v699_v10, %v805_v15  ;;  %v784_v18 = vmul.f32 0.2, %v2415_v52  ;;  %vm944_vm0 = vcmask 261120  }
 0x115   : > { %v704_v22 = vadd.f32 %v2409_v48, %v703_v20  ;;  %v836_v23 = vsel %vm772_vm1, %v694_v13, %v804_v17  ;;  %v785_v17 = vmul.f32 0.2, %v2412_v50  ;;  %vm953_vm1 = vcmask 523264  }
 0x116   : > { %vm775_vm2 = vcmp.ge.f32.partialorder %v709_v19, 0.0  ;;  %v807_v24 = vmul.f32 0.2, %v709_v19  ;;  %v2172_v25 = vpack.i.bf16 %v837_v21, %v836_v23 }
 0x117   : > { %vm774_vm3 = vcmp.ge.f32.partialorder %v704_v22, 0.0  ;;  %v806_v26 = vmul.f32 0.2, %v704_v22  ;;  %v1879_v27 = vpop.f32.mrb[24].mxu1  ;;  %v817_v23 = vsel %vm753_vm12, %v2412_v50, %v785_v17 }
 0x118   : > { %v719_v28 = vadd.f32 %v1879_v27, %v2409_v48  ;;  %v713_v29 = vpop.f32.mrb[25].mxu1  ;;  %2173 = vrot.lane.b32.xlu1 %v2172_v25, %s2231_s27  ;;  %v839_v30 = vsel %vm775_vm2, %v709_v19, %v807_v24  ;;  %v787_v19 = vmul.f32 0.2, %v2418_v54  ;;  %v816_v24 = vsel %vm752_vm13, %v2415_v52, %v784_v18 }
 0x119   : > { %v714_v31 = vadd.f32 %v2409_v48, %v713_v29  ;;  %v838_v32 = vsel %vm774_vm3, %v704_v22, %v806_v26  ;;  %v818_v27 = vsel %vm754_vm15, %v2421_v56, %v786_v45  ;;  %vm962_vm2 = vcmask 785408  }
 0x11a   : > { %vm777_vm4 = vcmp.ge.f32.partialorder %v719_v28, 0.0  ;;  %v809_v33 = vmul.f32 0.2, %v719_v28  ;;  %v2197_v34 = vpack.i.bf16 %v839_v30, %v838_v32  ;;  %v819_v25 = vsel %vm755_vm14, %v2418_v54, %v787_v19 }
 0x11b   : > { %vm776_vm5 = vcmp.ge.f32.partialorder %v714_v31, 0.0  ;;  %v808_v35 = vmul.f32 0.2, %v714_v31  ;;  %v1882_v36 = vpop.f32.mrb[26].mxu1  ;;  %v788_v56 = vmul.f32 0.2, %v2427_v60 }
 0x11c   : > { %v729_v37 = vadd.f32 %v1882_v36, %v2409_v48  ;;  %v723_v38 = vpop.f32.mrb[27].mxu1  ;;  %v841_v39 = vsel %vm777_vm4, %v719_v28, %v809_v33  ;;  %v789_v36 = vmul.f32 0.2, %v2424_v58  ;;  %vm757_vm3 = vcmp.ge.f32.partialorder %v2424_v58, 0.0 }
 0x11d   : > { %v724_v40 = vadd.f32 %v2409_v48, %v723_v38  ;;  %v840_v41 = vsel %vm776_vm5, %v714_v31, %v808_v35  ;;  %vm756_vm4 = vcmp.ge.f32.partialorder %v2427_v60, 0.0  ;;  %vm759_vm5 = vcmp.ge.f32.partialorder %v2430_v62, 0.0 }
 0x11e   : > { %vm779_vm6 = vcmp.ge.f32.partialorder %v729_v37, 0.0  ;;  %v811_v42 = vmul.f32 0.2, %v729_v37  ;;  %v2177_v43 = vpack.i.bf16 %v841_v39, %v840_v41 }
 0x11f   : > { %vm778_vm7 = vcmp.ge.f32.partialorder %v724_v40, 0.0  ;;  %v810_v44 = vmul.f32 0.2, %v724_v40  ;;  %v1885_v46 = vpop.f32.mrb[28].mxu1 }
 0x120   : > { %v739_v47 = vadd.f32 %v1885_v46, %v2409_v48  ;;  %v733_v51 = vpop.f32.mrb[29].mxu1  ;;  %2178 = vrot.lane.b32.xlu1 %v2177_v43, %s2232_s28  ;;  %v843_v55 = vsel %vm779_vm6, %v729_v37, %v811_v42  ;;  %vm758_vm6 = vcmp.ge.f32.partialorder %v2433_v0, 0.0 }
 0x121   : > { %v734_v57 = vadd.f32 %v2409_v48, %v733_v51  ;;  %v842_v59 = vsel %vm778_vm7, %v724_v40, %v810_v44 }
 0x122   : > { %vm781_vm8 = vcmp.ge.f32.partialorder %v739_v47, 0.0  ;;  %v813_v61 = vmul.f32 0.2, %v739_v47  ;;  %v2182_v63 = vpack.i.bf16 %v843_v55, %v842_v59  ;;  %v821_v59 = vsel %vm757_vm3, %v2424_v58, %v789_v36  ;;  %v1165_v36 = vld [vmem:[%s3100_s3 + $0xb0] sm:$0xff] }
 0x123   : > { %vm780_vm9 = vcmp.ge.f32.partialorder %v734_v57, 0.0  ;;  %v812_v1 = vmul.f32 0.2, %v734_v57  ;;  %v1888_v2 = vpop.f32.mrb[30].mxu1  ;;  %vm1621_vm3 = vcmask 1040384  }
 0x124   : > { %v749_v3 = vadd.f32 %v1888_v2, %v2409_v48  ;;  %v743_v4 = vpop.f32.mrb[31].mxu1  ;;  %2183 = vrot.lane.b32.xlu1 %v2182_v63, %s2232_s28  ;;  %v845_v5 = vsel %vm781_vm8, %v739_v47, %v813_v61  ;;  %v820_v61 = vsel %vm756_vm4, %v2427_v60, %v788_v56  ;;  %v791_v2 = vmul.f32 0.2, %v2430_v62  ;;  %v1166_v56 = vld [vmem:[%s3100_s3 + $0xb8] sm:$0xff] }
 0x125   : > { %v744_v6 = vadd.f32 %v2409_v48, %v743_v4  ;;  %v844_v7 = vsel %vm780_vm9, %v734_v57, %v812_v1  ;;  %vm1646_vm4 = vcmask 0  }
 0x126   : > { %vm783_vm10 = vcmp.ge.f32.partialorder %v749_v3, 0.0  ;;  %v815_v8 = vmul.f32 0.2, %v749_v3  ;;  %v2192_v9 = vpack.i.bf16 %v845_v5, %v844_v7 }
 0x127   : > { %vm782_vm11 = vcmp.ge.f32.partialorder %v744_v6, 0.0  ;;  %v814_v10 = vmul.f32 0.2, %v744_v6 }
 0x128   : > { %2188 = vrot.lane.b32.xlu1 %v2187_v53, %s2230_s17  ;;  %2193 = vrot.lane.b32.xlu0 %v2192_v9, %s2232_s28  ;;  %v847_v11 = vsel %vm783_vm10, %v749_v3, %v815_v8  ;;  %v790_v3 = vmul.f32 0.2, %v2433_v0 }
 0x129   : > { %v846_v12 = vsel %vm782_vm11, %v744_v6, %v814_v10 }
 0x12a   : > { %v2202_v13 = vpack.i.bf16 %v847_v11, %v846_v12 }
 0x12c   : > { %2203 = vrot.lane.b32.xlu1 %v2202_v13, %s2232_s28  ;;  %2198 = vrot.lane.b32.xlu0 %v2197_v34, %s2231_s27 }
 0x172   : > { %v2149_v14 = vpop.permute.xlu0 %2148 }
 0x173   : > { %v2151_v53 = vunpack.i.h.bf16 %v2149_v14  ;;  %v2150_v20 = vunpack.i.l.bf16 %v2149_v14  ;;  %v823_v14 = vsel %vm759_vm5, %v2430_v62, %v791_v2  ;;  %v1172_v2 = vld [vmem:[%s3100_s3 + $0xe8] sm:$0xff] }
 0x175   : > { %v946_v31 = vsel %vm944_vm0, %v817_v23, %v2151_v53  ;;  %v945_v34 = vsel %vm944_vm0, %v816_v24, %v2150_v20  ;;  %v1160_v23 = vld [vmem:[%s3100_s3 + $0x88] sm:$0xff]  ;;  %v1143_v24 = vld [vmem:[%s3100_s3] sm:$0xff] }
 0x176   : > { %v2154_v15 = vpop.permute.xlu1 %2153 }
 0x177   : > { %v2156_v28 = vunpack.i.h.bf16 %v2154_v15  ;;  %v2155_v29 = vunpack.i.l.bf16 %v2154_v15 }
 0x179   : > { %v947_v40 = vsel %vm944_vm0, %v818_v27, %v2155_v29  ;;  %v948_v41 = vsel %vm944_vm0, %v819_v25, %v2156_v28  ;;  %v1161_v27 = vld [vmem:[%s3100_s3 + $0x90] sm:$0xff]  ;;  %v1162_v28 = vld [vmem:[%s3100_s3 + $0x98] sm:$0xff] }
 0x17a   : > { %v2500_v48 = vpop.permute.xlu0 %2158 }
 0x17b   : > { %v2161_v42 = vunpack.i.h.bf16 %v2500_v48  ;;  %v2160_v43 = vunpack.i.l.bf16 %v2500_v48  ;;  %v822_v48 = vsel %vm758_vm6, %v2433_v0, %v790_v3 }
 0x17d   : > { %v949_v58 = vsel %vm944_vm0, %v820_v61, %v2160_v43  ;;  %v950_v60 = vsel %vm944_vm0, %v821_v59, %v2161_v42  ;;  %v1168_v42 = vld [vmem:[%s3100_s3 + $0xc8] sm:$0xff]  ;;  %v1153_v61 = vld [vmem:[%s3100_s3 + $0x50] sm:$0xff] }
 0x182   : > { %v2164_v16 = vpop.permute.xlu0 %2163 }
 0x183   : > { %v2166_v21 = vunpack.i.h.bf16 %v2164_v16  ;;  %v2165_v22 = vunpack.i.l.bf16 %v2164_v16 }
 0x185   : > { %v955_v50 = vsel %vm953_vm1, %v946_v31, %v2166_v21  ;;  %v954_v54 = vsel %vm953_vm1, %v945_v34, %v2165_v22  ;;  %v1159_v22 = vld [vmem:[%s3100_s3 + $0x80] sm:$0xff]  ;;  %v1145_v31 = vld [vmem:[%s3100_s3 + $0x10] sm:$0xff]  ;;  %v1164_v34 = vld [vmem:[%s3100_s3 + $0xa8] sm:$0xff] }
 0x186   : > { %v2169_v26 = vpop.permute.xlu0 %2168  ;;  %v1971_v25 = vpack.c.bf16 %v1160_v23, %v1159_v22 }
 0x187   : > { %v2171_v35 = vunpack.i.h.bf16 %v2169_v26  ;;  %v2170_v52 = vunpack.i.l.bf16 %v2169_v26  ;;  %v1144_v26 = vld [vmem:[%s3100_s3 + $0x8] sm:$0xff] }
 0x188   : > { %v1973_v29 = vpack.c.bf16 %v1144_v26, %v1143_v24  ;;  %1972 = vmatprep.subr.bf16.mxu1 %v1971_v25 }
 0x189   : > { %v956_v55 = vsel %vm953_vm1, %v947_v40, %v2170_v52  ;;  %v957_v57 = vsel %vm953_vm1, %v948_v41, %v2171_v35  ;;  %v1147_v52 = vld [vmem:[%s3100_s3 + $0x20] sm:$0xff]  ;;  %v1150_v40 = vld [vmem:[%s3100_s3 + $0x38] sm:$0xff] }
 0x18a   : > { %v2509_v49 = vpop.permute.xlu1 %2173  ;;  %v1167_v41 = vld [vmem:[%s3100_s3 + $0xc0] sm:$0xff] }
 0x18b   : > { %v2176_v47 = vunpack.i.h.bf16 %v2509_v49  ;;  %v2175_v51 = vunpack.i.l.bf16 %v2509_v49 }
 0x18d   : > { %v958_v10 = vsel %vm953_vm1, %v949_v58, %v2175_v51  ;;  %v959_v11 = vsel %vm953_vm1, %v950_v60, %v2176_v47  ;;  %v1152_v47 = vld [vmem:[%s3100_s3 + $0x48] sm:$0xff]  ;;  %v1169_v51 = vld [vmem:[%s3100_s3 + $0xd0] sm:$0xff]  ;;  %v1736_v58 = vld [vmem:[%s3104_s7] ss:$0 sm:$0xff] }
 0x192   : > { %v2179_v30 = vpop.permute.xlu1 %2178 }
 0x193   : > { %v2181_v32 = vunpack.i.h.bf16 %v2179_v30  ;;  %v2180_v33 = vunpack.i.l.bf16 %v2179_v30  ;;  %v1975_v30 = vpack.c.bf16 %v1162_v28, %v1161_v27  ;;  %v1270_v27 = vld [vmem:[%s3101_s4 + $0x8] sm:$0xff]  ;;  %v1272_v28 = vld [vmem:[%s3101_s4 + $0x18] sm:$0xff] }
 0x195   : > { %v963_v37 = vsel %vm962_vm2, %v954_v54, %v2180_v33  ;;  %v964_v38 = vsel %vm962_vm2, %v955_v50, %v2181_v32  ;;  %v1146_v32 = vld [vmem:[%s3100_s3 + $0x18] sm:$0xff]  ;;  %v1163_v33 = vld [vmem:[%s3100_s3 + $0xa0] sm:$0xff]  ;;  %v1148_v54 = vld [vmem:[%s3100_s3 + $0x28] sm:$0xff] }
 0x196   : > { %v2184_v39 = vpop.permute.xlu1 %2183  ;;  %1921 = vmatprep.mubr.f32.mxu1 %v963_v37  ;;  %v1977_v50 = vpack.c.bf16 %v1146_v32, %v1145_v31  ;;  %v1979_v35 = vpack.c.bf16 %v1164_v34, %v1163_v33  ;;  %v1981_v37 = vpack.c.bf16 %v1148_v54, %v1147_v52  ;;  %v2003_v33 = vpack.c.bf16 %v1272_v28, %v1270_v27  ;;  %v1271_v34 = vld [vmem:[%s3101_s4 + $0x10] sm:$0xff]  ;;  %v1308_v27 = vld [vmem:[%s3101_s4 + $0x138] sm:$0xff] }
 0x197   : > { %v2186_v44 = vunpack.i.h.bf16 %v2184_v39  ;;  %v2185_v46 = vunpack.i.l.bf16 %v2184_v39  ;;  %1922 = vmatmul.mubr.f32.vlgmr.msra.gmra.mrb[32].mxu1 %v964_v38  ;;  %v1983_v38 = vpack.c.bf16 %v1166_v56, %v1165_v36  ;;  %v1149_v39 = vld [vmem:[%s3100_s3 + $0x30] sm:$0xff] }
 0x198   : > { %1974 = vmatpush3.bf16.msra.mxu1 %v1973_v29  ;;  %v1985_v43 = vpack.c.bf16 %v1150_v40, %v1149_v39  ;;  %v1269_v29 = vld [vmem:[%s3101_s4] sm:$0xff]  ;;  %v1278_v39 = vld [vmem:[%s3101_s4 + $0x48] sm:$0xff]  ;;  %2004 = vmatprep.subr.bf16.mxu0 %v2003_v33  ;;  %v1312_v33 = vld [vmem:[%s3101_s4 + $0x158] sm:$0xff] }
 0x199   : > { %v965_v63 = vsel %vm962_vm2, %v956_v55, %v2185_v46  ;;  %v966_v1 = vsel %vm962_vm2, %v957_v57, %v2186_v44  ;;  %1976 = vmatprep.subr.bf16.mxu1 %v1975_v30  ;;  %v1987_v44 = vpack.c.bf16 %v1168_v42, %v1167_v41  ;;  %v1151_v46 = vld [vmem:[%s3100_s3 + $0x40] sm:$0xff]  ;;  %v1170_v55 = vld [vmem:[%s3100_s3 + $0xd8] sm:$0xff]  ;;  %v2005_v36 = vpack.c.bf16 %v1271_v34, %v1269_v29 }
 0x19a   : > { %v2189_v4 = vpop.permute.xlu1 %2188  ;;  %v2194_v5 = vpop.permute.xlu0 %2193  ;;  %1924 = vmatprep.mubr.f32.mxu1 %v965_v63  ;;  %v1989_v57 = vpack.c.bf16 %v1152_v47, %v1151_v46  ;;  %v1991_v59 = vpack.c.bf16 %v1170_v55, %v1169_v51  ;;  %v1154_v63 = vld [vmem:[%s3100_s3 + $0x58] sm:$0xff]  ;;  %v1279_v46 = vld [vmem:[%s3101_s4 + $0x50] sm:$0xff]  ;;  %v1282_v47 = vld [vmem:[%s3101_s4 + $0x68] sm:$0xff] }
 0x19b   : > { %v2196_v6 = vunpack.i.h.bf16 %v2194_v5  ;;  %v2195_v7 = vunpack.i.l.bf16 %v2194_v5  ;;  %1925 = vmatmul.mubr.f32.gmra.mrb[34].mxu1 %v966_v1  ;;  %v2191_v8 = vunpack.i.h.bf16 %v2189_v4  ;;  %v2190_v9 = vunpack.i.l.bf16 %v2189_v4  ;;  %v1171_v1 = vld [vmem:[%s3100_s3 + $0xe0] sm:$0xff]  ;;  %v1280_v41 = vld [vmem:[%s3101_s4 + $0x58] sm:$0xff]  ;;  %2006 = vmatpush1.bf16.msra.mxu0 %v2005_v36 }
 0x19c   : > { %1978 = vmatpush3.bf16.msra.mxu1 %v1977_v50  ;;  %v1993_v3 = vpack.c.bf16 %v1154_v63, %v1153_v61  ;;  %v1995_v4 = vpack.c.bf16 %v1172_v2, %v1171_v1  ;;  %v1155_v5 = vld [vmem:[%s3100_s3 + $0x60] sm:$0xff]  ;;  %v1274_v50 = vld [vmem:[%s3101_s4 + $0x28] sm:$0xff]  ;;  %v1284_v51 = vld [vmem:[%s3101_s4 + $0x78] sm:$0xff] }
 0x19d   : > { %v967_v12 = vsel %vm962_vm2, %v958_v10, %v2195_v7  ;;  %v968_v13 = vsel %vm962_vm2, %v959_v11, %v2196_v6  ;;  %v951_v49 = vsel %vm944_vm0, %v822_v48, %v2190_v9  ;;  %v952_v53 = vsel %vm944_vm0, %v823_v14, %v2191_v8  ;;  %1980 = vmatprep.subr.bf16.mxu1 %v1979_v35  ;;  %v1156_v6 = vld [vmem:[%s3100_s3 + $0x68] sm:$0xff]  ;;  %v1174_v14 = vld [vmem:[%s3100_s3 + $0xf8] sm:$0xff]  ;;  %v1283_v61 = vld [vmem:[%s3101_s4 + $0x70] sm:$0xff] }
 0x19e   : > { %v2204_v15 = vpop.permute.xlu1 %2203  ;;  %v2199_v16 = vpop.permute.xlu0 %2198  ;;  %1927 = vmatprep.mubr.f32.mxu1 %v967_v12  ;;  %v1997_v7 = vpack.c.bf16 %v1156_v6, %v1155_v5  ;;  %v1276_v35 = vld [vmem:[%s3101_s4 + $0x38] sm:$0xff]  ;;  %v1286_v63 = vld [vmem:[%s3101_s4 + $0x88] sm:$0xff]  ;;  %v1287_v5 = vld [vmem:[%s3101_s4 + $0x90] sm:$0xff] }
 0x19f   : > { %v2206_v17 = vunpack.i.h.bf16 %v2204_v15  ;;  %v2205_v18 = vunpack.i.l.bf16 %v2204_v15  ;;  %v2201_v19 = vunpack.i.h.bf16 %v2199_v16  ;;  %v2200_v45 = vunpack.i.l.bf16 %v2199_v16  ;;  %1928 = vmatmul.mubr.f32.gmra.mrb[36].mxu1 %v968_v13  ;;  %v1173_v13 = vld [vmem:[%s3100_s3 + $0xf0] sm:$0xff]  ;;  %v1158_v16 = vld [vmem:[%s3100_s3 + $0x78] sm:$0xff]  ;;  %v1290_v6 = vld [vmem:[%s3101_s4 + $0xa8] sm:$0xff] }
 0x1a0   : > { %1982 = vmatpush3.bf16.msra.mxu1 %v1981_v37  ;;  %v1999_v48 = vpack.c.bf16 %v1174_v14, %v1173_v13  ;;  %v1157_v15 = vld [vmem:[%s3100_s3 + $0x70] sm:$0xff]  ;;  %v2007_v56 = vpack.c.bf16 %v1276_v35, %v1274_v50  ;;  %v1273_v37 = vld [vmem:[%s3101_s4 + $0x20] sm:$0xff]  ;;  %v1288_v1 = vld [vmem:[%s3101_s4 + $0x98] sm:$0xff] }
 0x1a1   : > { %v960_v20 = vsel %vm953_vm1, %v951_v49, %v2200_v45  ;;  %v961_v62 = vsel %vm953_vm1, %v952_v53, %v2201_v19  ;;  %1984 = vmatprep.subr.bf16.mxu1 %v1983_v38  ;;  %v1275_v38 = vld [vmem:[%s3101_s4 + $0x30] sm:$0xff]  ;;  %v1296_v13 = vld [vmem:[%s3101_s4 + $0xd8] sm:$0xff]  ;;  %v1309_v35 = vld [vmem:[%s3101_s4 + $0x140] sm:$0xff] }
 0x1a2   : > { %v969_v21 = vsel %vm962_vm2, %v960_v20, %v2205_v18  ;;  %v970_v0 = vsel %vm962_vm2, %v961_v62, %v2206_v17  ;;  %v2001_v18 = vpack.c.bf16 %v1158_v16, %v1157_v15  ;;  %v2009_v42 = vpack.c.bf16 %v1275_v38, %v1273_v37  ;;  %2008 = vmatprep.subr.bf16.mxu0 %v2007_v56  ;;  %v1293_v15 = vld [vmem:[%s3101_s4 + $0xc0] sm:$0xff]  ;;  %v1295_v16 = vld [vmem:[%s3101_s4 + $0xd0] sm:$0xff]  ;;  %v1316_v36 = vld [vmem:[%s3101_s4 + $0x178] sm:$0xff] }
 0x1a3   : > { %1930 = vmatprep.mubr.f32.mxu1 %v969_v21  ;;  %v1313_v38 = vld [vmem:[%s3101_s4 + $0x160] sm:$0xff] }
 0x1a4   : > { %1931 = vmatmul.mubr.f32.gmra.mrb[38].mxu1 %v970_v0  ;;  %2010 = vmatpush1.bf16.msra.mxu0 %v2009_v42 }
 0x1a5   : > { %1986 = vmatpush3.bf16.msra.mxu1 %v1985_v43  ;;  %v2011_v43 = vpack.c.bf16 %v1280_v41, %v1278_v39  ;;  %v1315_v39 = vld [vmem:[%s3101_s4 + $0x170] sm:$0xff]  ;;  %v1320_v41 = vld [vmem:[%s3101_s4 + $0x198] sm:$0xff] }
 0x1a6   : > { %1988 = vmatprep.subr.bf16.mxu1 %v1987_v44  ;;  %v1277_v44 = vld [vmem:[%s3101_s4 + $0x40] sm:$0xff]  ;;  %v2049_v42 = vpack.c.bf16 %v1315_v39, %v1313_v38 }
 0x1a7   : > { %v2013_v55 = vpack.c.bf16 %v1279_v46, %v1277_v44  ;;  %2012 = vmatprep.subr.bf16.mxu0 %v2011_v43  ;;  %v1317_v44 = vld [vmem:[%s3101_s4 + $0x180] sm:$0xff]  ;;  %v1319_v46 = vld [vmem:[%s3101_s4 + $0x190] sm:$0xff] }
 0x1a9   : > { %1990 = vmatpush3.bf16.msra.mxu1 %v1989_v57  ;;  %v2015_v57 = vpack.c.bf16 %v1284_v51, %v1282_v47  ;;  %2014 = vmatpush1.bf16.msra.mxu0 %v2013_v55  ;;  %v1322_v47 = vld [vmem:[%s3101_s4 + $0x1a8] sm:$0xff]  ;;  %v1324_v51 = vld [vmem:[%s3101_s4 + $0x1b8] sm:$0xff]  ;;  %v2053_v55 = vpack.c.bf16 %v1319_v46, %v1317_v44 }
 0x1aa   : > { %1992 = vmatprep.subr.bf16.mxu1 %v1991_v59  ;;  %v1281_v59 = vld [vmem:[%s3101_s4 + $0x60] sm:$0xff]  ;;  %v1344_v44 = vld [vmem:[%s3101_s4 + $0x258] sm:$0xff] }
 0x1ab   : > { %v2017_v2 = vpack.c.bf16 %v1283_v61, %v1281_v59  ;;  %2016 = vmatprep.subr.bf16.mxu0 %v2015_v57  ;;  %v2055_v57 = vpack.c.bf16 %v1324_v51, %v1322_v47 }
 0x1ad   : > { %1994 = vmatpush3.bf16.msra.mxu1 %v1993_v3  ;;  %v2019_v3 = vpack.c.bf16 %v1288_v1, %v1286_v63  ;;  %2018 = vmatpush1.bf16.msra.mxu0 %v2017_v2 }
 0x1ae   : > { %1996 = vmatprep.subr.bf16.mxu1 %v1995_v4  ;;  %v1285_v4 = vld [vmem:[%s3101_s4 + $0x80] sm:$0xff] }
 0x1af   : > { %2020 = vmatprep.subr.bf16.mxu0 %v2019_v3 }
 0x1b1   : > { %1998 = vmatpush3.bf16.msra.mxu1 %v1997_v7  ;;  %v1292_v7 = vld [vmem:[%s3101_s4 + $0xb8] sm:$0xff] }
 0x1b2   : > { %2000 = vmatprep.subr.bf16.mxu1 %v1999_v48 }
 0x1b5   : > { %2002 = vmatpush3.bf16.msra.mxu1 %v2001_v18  ;;  %v1300_v18 = vld [vmem:[%s3101_s4 + $0xf8] sm:$0xff] }
 0x26a   : > { %v1923_v60 = vpop.f32.mrb[32].mxu1 }
 0x26b   : > { %v2647_v8 = vadd.f32 %v1923_v60, %v1736_v58  ;;  %v1060_v9 = vpop.f32.mrb[33].mxu1  ;;  %v2023_v60 = vpack.c.bf16 %v1292_v7, %v1290_v6 }
 0x26c   : > { %v2649_v10 = vadd.f32 %v1736_v58, %v1060_v9  ;;  %v1289_v9 = vld [vmem:[%s3101_s4 + $0xa0] sm:$0xff] }
 0x26d   : > { %vm1100_vm14 = vcmp.ge.f32.partialorder %v2647_v8, 0.0 }
 0x26e   : > { %v1926_v11 = vpop.f32.mrb[34].mxu1  ;;  %v1107_v59 = vmul.f32 0.2, %v2649_v10  ;;  %vm1099_vm11 = vcmp.ge.f32.partialorder %v2649_v10, 0.0 }
 0x26f   : > { %v1070_v12 = vpop.f32.mrb[35].mxu1  ;;  %v1076_v49 = vadd.f32 %v1926_v11, %v1736_v58  ;;  %v1291_v11 = vld [vmem:[%s3101_s4 + $0xb0] sm:$0xff] }
 0x270   : > { %v1071_v53 = vadd.f32 %v1736_v58, %v1070_v12  ;;  %v1294_v12 = vld [vmem:[%s3101_s4 + $0xc8] sm:$0xff]  ;;  %v2025_v14 = vpack.c.bf16 %v1291_v11, %v1289_v9  ;;  %v1115_v6 = vsel %vm1099_vm11, %v2649_v10, %v1107_v59  ;;  %v1343_v59 = vld [vmem:[%s3101_s4 + $0x250] sm:$0xff] }
 0x271   : > { %v1110_v21 = vmul.f32 0.2, %v1076_v49  ;;  %vm1102_vm7 = vcmp.ge.f32.partialorder %v1076_v49, 0.0  ;;  %v2027_v48 = vpack.c.bf16 %v1296_v13, %v1294_v12 }
 0x272   : > { %v1929_v17 = vpop.f32.mrb[36].mxu1  ;;  %v1109_v0 = vmul.f32 0.2, %v1071_v53  ;;  %vm1101_vm8 = vcmp.ge.f32.partialorder %v1071_v53, 0.0 }
 0x273   : > { %v2663_v19 = vadd.f32 %v1929_v17, %v1736_v58  ;;  %v1080_v45 = vpop.f32.mrb[37].mxu1  ;;  %v1118_v30 = vsel %vm1102_vm7, %v1076_v49, %v1110_v21  ;;  %v1298_v17 = vld [vmem:[%s3101_s4 + $0xe8] sm:$0xff] }
 0x274   : > { %v2665_v20 = vadd.f32 %v1736_v58, %v1080_v45  ;;  %v1117_v32 = vsel %vm1101_vm8, %v1071_v53, %v1109_v0  ;;  %v2029_v45 = vpack.c.bf16 %v1295_v16, %v1293_v15  ;;  %v2031_v49 = vpack.c.bf16 %v1300_v18, %v1298_v17  ;;  %v1297_v53 = vld [vmem:[%s3101_s4 + $0xe0] sm:$0xff]  ;;  %v1302_v21 = vld [vmem:[%s3101_s4 + $0x108] sm:$0xff]  ;;  %v1304_v0 = vld [vmem:[%s3101_s4 + $0x118] sm:$0xff] }
 0x275   : > { %v1112_v1 = vmul.f32 0.2, %v2663_v19  ;;  %vm1104_vm13 = vcmp.ge.f32.partialorder %v2663_v19, 0.0  ;;  %v1325_v17 = vld [vmem:[%s3101_s4 + $0x1c0] sm:$0xff]  ;;  %v1327_v18 = vld [vmem:[%s3101_s4 + $0x1d0] sm:$0xff] }
 0x276   : > { %v1111_v61 = vmul.f32 0.2, %v2665_v20  ;;  %vm1103_vm12 = vcmp.ge.f32.partialorder %v2665_v20, 0.0 }
 0x277   : > { %v1932_v62 = vpop.f32.mrb[38].mxu1  ;;  %v1120_v12 = vsel %vm1104_vm13, %v2663_v19, %v1112_v1  ;;  %v1326_v19 = vld [vmem:[%s3101_s4 + $0x1c8] sm:$0xff] }
 0x278   : > { %v1096_v22 = vadd.f32 %v1932_v62, %v1736_v58  ;;  %v1090_v23 = vpop.f32.mrb[39].mxu1  ;;  %v1299_v62 = vld [vmem:[%s3101_s4 + $0xf0] sm:$0xff]  ;;  %v1119_v7 = vsel %vm1103_vm12, %v2665_v20, %v1111_v61  ;;  %v1346_v61 = vld [vmem:[%s3101_s4 + $0x268] sm:$0xff] }
 0x279   : > { %v1091_v24 = vadd.f32 %v1736_v58, %v1090_v23  ;;  %v2021_v58 = vpack.c.bf16 %v1287_v5, %v1285_v4  ;;  %v2035_v23 = vpack.c.bf16 %v1304_v0, %v1302_v21  ;;  %v1329_v21 = vld [vmem:[%s3101_s4 + $0x1e0] sm:$0xff]  ;;  %v1331_v0 = vld [vmem:[%s3101_s4 + $0x1f0] sm:$0xff] }
 0x27a   : > { %vm1106_vm9 = vcmp.ge.f32.partialorder %v1096_v22, 0.0  ;;  %v1114_v25 = vmul.f32 0.2, %v1096_v22 }
 0x27b   : > { %vm1105_vm10 = vcmp.ge.f32.partialorder %v1091_v24, 0.0  ;;  %v1113_v26 = vmul.f32 0.2, %v1091_v24  ;;  %2022 = vmatpush1.bf16.msra.mxu0 %v2021_v58  ;;  %v1108_v58 = vmul.f32 0.2, %v2647_v8 }
 0x27c   : > { %v1122_v31 = vsel %vm1106_vm9, %v1096_v22, %v1114_v25  ;;  %2024 = vmatprep.subr.bf16.mxu0 %v2023_v60  ;;  %v2033_v22 = vpack.c.bf16 %v1299_v62, %v1297_v53  ;;  %v1303_v25 = vld [vmem:[%s3101_s4 + $0x110] sm:$0xff]  ;;  %v1332_v53 = vld [vmem:[%s3101_s4 + $0x1f8] sm:$0xff] }
 0x27d   : > { %v2212_v52 = vpack.i.bf16 %v1118_v30, %v1122_v31  ;;  %v1121_v54 = vsel %vm1105_vm10, %v1091_v24, %v1113_v26  ;;  %v1301_v24 = vld [vmem:[%s3101_s4 + $0x100] sm:$0xff]  ;;  %v1306_v26 = vld [vmem:[%s3101_s4 + $0x128] sm:$0xff]  ;;  %v1307_v31 = vld [vmem:[%s3101_s4 + $0x130] sm:$0xff]  ;;  %v1116_v10 = vsel %vm1100_vm14, %v2647_v8, %v1108_v58 }
 0x27e   : > { %v2207_v40 = vpack.i.bf16 %v1117_v32, %v1121_v54  ;;  %v2037_v28 = vpack.c.bf16 %v1303_v25, %v1301_v24  ;;  %v2039_v29 = vpack.c.bf16 %v1308_v27, %v1306_v26  ;;  %v1305_v30 = vld [vmem:[%s3101_s4 + $0x120] sm:$0xff]  ;;  %v1310_v32 = vld [vmem:[%s3101_s4 + $0x148] sm:$0xff]  ;;  %v1328_v8 = vld [vmem:[%s3101_s4 + $0x1d8] sm:$0xff] }
 0x27f   : > { %2213 = vrot.lane.b32.xlu1 %v2212_v52, %s2231_s27  ;;  %2026 = vmatpush1.bf16.msra.mxu0 %v2025_v14  ;;  %v2041_v34 = vpack.c.bf16 %v1307_v31, %v1305_v30  ;;  %v2043_v50 = vpack.c.bf16 %v1312_v33, %v1310_v32  ;;  %v1311_v52 = vld [vmem:[%s3101_s4 + $0x150] sm:$0xff]  ;;  %v1314_v54 = vld [vmem:[%s3101_s4 + $0x168] sm:$0xff]  ;;  %v1321_v14 = vld [vmem:[%s3101_s4 + $0x1a0] sm:$0xff]  ;;  %v2059_v16 = vpack.c.bf16 %v1328_v8, %v1326_v19 }
 0x280   : > { %2208 = vrot.lane.b32.xlu0 %v2207_v40, %s2231_s27  ;;  %2028 = vmatprep.subr.bf16.mxu0 %v2027_v48  ;;  %v2045_v56 = vpack.c.bf16 %v1311_v52, %v1309_v35  ;;  %v2047_v37 = vpack.c.bf16 %v1316_v36, %v1314_v54  ;;  %v1318_v40 = vld [vmem:[%s3101_s4 + $0x188] sm:$0xff]  ;;  %v1323_v48 = vld [vmem:[%s3101_s4 + $0x1b0] sm:$0xff]  ;;  %v1336_v24 = vld [vmem:[%s3101_s4 + $0x218] sm:$0xff] }
 0x281   : > { %v2051_v43 = vpack.c.bf16 %v1320_v41, %v1318_v40  ;;  %v2057_v15 = vpack.c.bf16 %v1323_v48, %v1321_v14  ;;  %v1737_v27 = vld [vmem:[%s3105_s8] ss:$0 sm:$0xff]  ;;  %v1335_v35 = vld [vmem:[%s3101_s4 + $0x210] sm:$0xff]  ;;  %v1338_v52 = vld [vmem:[%s3101_s4 + $0x228] sm:$0xff] }
 0x282   : > { %v1340_v54 = vld [vmem:[%s3101_s4 + $0x238] sm:$0xff]  ;;  %v1337_v41 = vld [vmem:[%s3101_s4 + $0x220] sm:$0xff]  ;;  %v1355_v14 = vld [vmem:[%s3101_s4 + $0x2b0] sm:$0xff] }
 0x283   : > { %2030 = vmatpush1.bf16.msra.mxu0 %v2029_v45  ;;  %v2061_v45 = vpack.c.bf16 %v1327_v18, %v1325_v17  ;;  %v2071_v40 = vpack.c.bf16 %v1340_v54, %v1338_v52  ;;  %v1358_v48 = vld [vmem:[%s3101_s4 + $0x2c8] sm:$0xff]  ;;  %v1359_v17 = vld [vmem:[%s3101_s4 + $0x2d0] sm:$0xff]  ;;  %v1373_v52 = vld [vmem:[%s3101_s4 + $0x340] sm:$0xff] }
 0x284   : > { %2032 = vmatprep.subr.bf16.mxu0 %v2031_v49  ;;  %v1330_v49 = vld [vmem:[%s3101_s4 + $0x1e8] sm:$0xff]  ;;  %v1375_v54 = vld [vmem:[%s3101_s4 + $0x350] sm:$0xff] }
 0x285   : > { %v2063_v62 = vpack.c.bf16 %v1332_v53, %v1330_v49  ;;  %v1362_v18 = vld [vmem:[%s3101_s4 + $0x2e8] sm:$0xff] }
 0x287   : > { %2034 = vmatpush1.bf16.msra.mxu0 %v2033_v22  ;;  %v2065_v22 = vpack.c.bf16 %v1331_v0, %v1329_v21  ;;  %v1363_v21 = vld [vmem:[%s3101_s4 + $0x2f0] sm:$0xff]  ;;  %v1366_v0 = vld [vmem:[%s3101_s4 + $0x308] sm:$0xff] }
 0x288   : > { %2036 = vmatprep.subr.bf16.mxu0 %v2035_v23  ;;  %v1334_v23 = vld [vmem:[%s3101_s4 + $0x208] sm:$0xff] }
 0x289   : > { %v2067_v25 = vpack.c.bf16 %v1336_v24, %v1334_v23 }
 0x28b   : > { %2038 = vmatpush1.bf16.msra.mxu0 %v2037_v28 }
 0x28c   : > { %2040 = vmatprep.subr.bf16.mxu0 %v2039_v29 }
 0x28f   : > { %2042 = vmatpush1.bf16.msra.mxu0 %v2041_v34 }
 0x290   : > { %2044 = vmatprep.subr.bf16.mxu0 %v2043_v50  ;;  %v1333_v50 = vld [vmem:[%s3101_s4 + $0x200] sm:$0xff] }
 0x291   : > { %v2069_v38 = vpack.c.bf16 %v1335_v35, %v1333_v50 }
 0x293   : > { %2046 = vmatpush1.bf16.msra.mxu0 %v2045_v56 }
 0x294   : > { %2048 = vmatprep.subr.bf16.mxu0 %v2047_v37 }
 0x297   : > { %2050 = vmatpush1.bf16.msra.mxu0 %v2049_v42  ;;  %v1339_v42 = vld [vmem:[%s3101_s4 + $0x230] sm:$0xff] }
 0x298   : > { %2052 = vmatprep.subr.bf16.mxu0 %v2051_v43  ;;  %v1342_v43 = vld [vmem:[%s3101_s4 + $0x248] sm:$0xff]  ;;  %v2073_v51 = vpack.c.bf16 %v1339_v42, %v1337_v41  ;;  %v1384_v42 = vld [vmem:[%s3101_s4 + $0x398] sm:$0xff] }
 0x299   : > { %v1382_v41 = vld [vmem:[%s3101_s4 + $0x388] sm:$0xff] }
 0x29b   : > { %2054 = vmatpush1.bf16.msra.mxu0 %v2053_v55  ;;  %v2075_v55 = vpack.c.bf16 %v1344_v44, %v1342_v43  ;;  %v2115_v44 = vpack.c.bf16 %v1384_v42, %v1382_v41 }
 0x29c   : > { %2056 = vmatprep.subr.bf16.mxu0 %v2055_v57  ;;  %v1341_v57 = vld [vmem:[%s3101_s4 + $0x240] sm:$0xff] }
 0x29d   : > { %v2077_v1 = vpack.c.bf16 %v1343_v59, %v1341_v57  ;;  %v1388_v57 = vld [vmem:[%s3101_s4 + $0x3b8] sm:$0xff] }
 0x29f   : > { %2058 = vmatpush1.bf16.msra.mxu0 %v2057_v15  ;;  %v1360_v15 = vld [vmem:[%s3101_s4 + $0x2d8] sm:$0xff] }
 0x2a0   : > { %2060 = vmatprep.subr.bf16.mxu0 %v2059_v16  ;;  %v2091_v8 = vpack.c.bf16 %v1360_v15, %v1358_v48  ;;  %v1357_v16 = vld [vmem:[%s3101_s4 + $0x2c0] sm:$0xff] }
 0x2a1   : > { %v2093_v49 = vpack.c.bf16 %v1359_v17, %v1357_v16  ;;  %v1397_v15 = vld [vmem:[%s3106_s9] sm:$0x3] }
 0x2a2   : > { %v1571_v17 = vld [vmem:[%s3102_s5] sm:$0xff] }
 0x2a3   : > { %2062 = vmatpush1.bf16.msra.mxu0 %v2061_v45  ;;  %v1364_v45 = vld [vmem:[%s3101_s4 + $0x2f8] sm:$0xff] }
 0x2a4   : > { %2064 = vmatprep.subr.bf16.mxu0 %v2063_v62  ;;  %v2095_v53 = vpack.c.bf16 %v1364_v45, %v1362_v18  ;;  %v1361_v62 = vld [vmem:[%s3101_s4 + $0x2e0] sm:$0xff] }
 0x2a5   : > { %v2097_v23 = vpack.c.bf16 %v1363_v21, %v1361_v62 }
 0x2a7   : > { %2066 = vmatpush1.bf16.msra.mxu0 %v2065_v22  ;;  %v1368_v22 = vld [vmem:[%s3101_s4 + $0x318] sm:$0xff] }
 0x2a8   : > { %2068 = vmatprep.subr.bf16.mxu0 %v2067_v25  ;;  %v2099_v24 = vpack.c.bf16 %v1368_v22, %v1366_v0  ;;  %v1365_v25 = vld [vmem:[%s3101_s4 + $0x300] sm:$0xff] }
 0x2f1   : > { %v2214_v63 = vpop.permute.xlu1 %2213 }
 0x2f2   : > { %v2209_v2 = vpop.permute.xlu0 %2208  ;;  %v2215_v3 = vunpack.i.l.bf16 %v2214_v63  ;;  %v2216_v11 = vunpack.i.h.bf16 %v2214_v63  ;;  %v1348_v63 = vld [vmem:[%s3101_s4 + $0x278] sm:$0xff] }
 0x2f3   : > { %v2211_v4 = vunpack.i.h.bf16 %v2209_v2  ;;  %v2210_v5 = vunpack.i.l.bf16 %v2209_v2  ;;  %v2079_v2 = vpack.c.bf16 %v1348_v63, %v1346_v61  ;;  %v1385_v63 = vld [vmem:[%s3101_s4 + $0x3a0] sm:$0xff] }
 0x2f4   : > { %v1142_v13 = vsel %vm953_vm1, %v1120_v12, %v2215_v3  ;;  %v1140_v20 = vsel %vm953_vm1, %v1116_v10, %v2216_v11  ;;  %v1345_v3 = vld [vmem:[%s3101_s4 + $0x260] sm:$0xff]  ;;  %v1354_v11 = vld [vmem:[%s3101_s4 + $0x2a8] sm:$0xff]  ;;  %v1356_v12 = vld [vmem:[%s3101_s4 + $0x2b8] sm:$0xff] }
 0x2f5   : > { %v1141_v60 = vsel %vm953_vm1, %v1119_v7, %v2210_v5  ;;  %v1139_v9 = vsel %vm953_vm1, %v1115_v6, %v2211_v4  ;;  %v1347_v4 = vld [vmem:[%s3101_s4 + $0x270] sm:$0xff]  ;;  %v1350_v5 = vld [vmem:[%s3101_s4 + $0x288] sm:$0xff]  ;;  %v1352_v6 = vld [vmem:[%s3101_s4 + $0x298] sm:$0xff]  ;;  %v2087_v10 = vpack.c.bf16 %v1356_v12, %v1354_v11 }
 0x2f6   : > { %1246 = vmatprep.mubr.f32.mxu1 %v1141_v60  ;;  %v2081_v7 = vpack.c.bf16 %v1347_v4, %v1345_v3  ;;  %v2083_v58 = vpack.c.bf16 %v1352_v6, %v1350_v5  ;;  %v1349_v60 = vld [vmem:[%s3101_s4 + $0x280] sm:$0xff]  ;;  %v1392_v3 = vld [vmem:[%s3101_s4 + $0x3d8] sm:$0xff] }
 0x2f7   : > { %1247 = vmatmul.mubr.f32.vlgmr.msra.gmra.mrb[40].mxu1 %v1139_v9  ;;  %v1351_v9 = vld [vmem:[%s3101_s4 + $0x290] sm:$0xff]  ;;  %v1389_v6 = vld [vmem:[%s3101_s4 + $0x3c0] sm:$0xff] }
 0x2f8   : > { %1251 = vmatprep.mubr.f32.mxu1 %v1142_v13  ;;  %v2085_v13 = vpack.c.bf16 %v1351_v9, %v1349_v60  ;;  %v1396_v60 = vld [vmem:[%s3101_s4 + $0x3f8] sm:$0xff]  ;;  %v1393_v12 = vld [vmem:[%s3101_s4 + $0x3e0] sm:$0xff] }
 0x2fb   : > { %1252 = vmatmul.mubr.f32.gmra.mrb[42].mxu1 %v1140_v20  ;;  %v1353_v20 = vld [vmem:[%s3101_s4 + $0x2a0] sm:$0xff] }
 0x2fc   : > { %v2089_v19 = vpack.c.bf16 %v1355_v14, %v1353_v20  ;;  %v1399_v20 = vlaneseq }
 0x2fe   : > { %v1400_v14 = vshrl.u32 %v1399_v20, 7 }
 0x300   : > { %v1401_v48 = vsub.s32 0, %v1400_v14  ;;  %v1583_v45 = vsub.s32 2, %v1400_v14  ;;  %v1587_v62 = vsub.s32 3, %v1400_v14 }
 0x3ca   : > { %v1831_v26 = vpop.f32.mrb[40].mxu1 }
 0x3cb   : > { %v1832_v28 = vpop.f32.mrb[41].mxu1 }
 0x3cc   : > { %v1833_v29 = vadd.f32 %v1832_v28, %v1831_v26  ;;  %v1367_v26 = vld [vmem:[%s3101_s4 + $0x310] sm:$0xff]  ;;  %v1372_v28 = vld [vmem:[%s3101_s4 + $0x338] sm:$0xff] }
 0x3ce   : > { %v1249_v30 = vadd.f32 %v1833_v29, %v1737_v27  ;;  %v1834_v31 = vpop.f32.mrb[42].mxu1  ;;  %v2101_v29 = vpack.c.bf16 %v1367_v26, %v1365_v25 }
 0x3cf   : > { %v1835_v32 = vpop.f32.mrb[43].mxu1 }
 0x3d0   : > { %v1836_v33 = vadd.f32 %v1835_v32, %v1834_v31  ;;  %vm1257_vm15 = vcmp.ge.f32.partialorder %v1249_v30, 0.0  ;;  %v1259_v34 = vmul.f32 0.2, %v1249_v30  ;;  %v1369_v31 = vld [vmem:[%s3101_s4 + $0x320] sm:$0xff]  ;;  %v1371_v32 = vld [vmem:[%s3101_s4 + $0x330] sm:$0xff] }
 0x3d1   : > { %v2105_v50 = vpack.c.bf16 %v1371_v32, %v1369_v31  ;;  %v1599_v32 = vsub.s32 6, %v1400_v14 }
 0x3d2   : > { %v1254_v36 = vadd.f32 %v1836_v33, %v1737_v27  ;;  %v1261_v56 = vsel %vm1257_vm15, %v1249_v30, %v1259_v34  ;;  %v1370_v27 = vld [vmem:[%s3101_s4 + $0x328] sm:$0xff]  ;;  %v1376_v34 = vld [vmem:[%s3101_s4 + $0x358] sm:$0xff] }
 0x3d3   : > { %v1264_v37 = vrot.slane %v1261_v56, 4  ;;  %v2103_v30 = vpack.c.bf16 %v1372_v28, %v1370_v27  ;;  %v1374_v33 = vld [vmem:[%s3101_s4 + $0x348] sm:$0xff]  ;;  %v1588_v27 = vrot.slane %v1571_v17, %v1587_v62  ;;  %v1595_v28 = vsub.s32 5, %v1400_v14 }
 0x3d4   : > { %vm1258_vm0 = vcmp.ge.f32.partialorder %v1254_v36, 0.0  ;;  %v1260_v39 = vmul.f32 0.2, %v1254_v36  ;;  %v2107_v35 = vpack.c.bf16 %v1376_v34, %v1374_v33 }
 0x3d5   : > { %1473 = vmatprep.mubr.f32.mxu0 %v1264_v37  ;;  %v2109_v37 = vpack.c.bf16 %v1375_v54, %v1373_v52 }
 0x3d6   : > { %1474 = vmatmul.mubr.f32.vlgmr.msra.gmra.mrb[0].mxu0 %v1261_v56  ;;  %v2910_v46 = vsel %vm1258_vm0, %v1254_v36, %v1260_v39  ;;  %v1378_v36 = vld [vmem:[%s3101_s4 + $0x368] sm:$0xff]  ;;  %v1380_v56 = vld [vmem:[%s3101_s4 + $0x378] sm:$0xff]  ;;  %v1377_v39 = vld [vmem:[%s3101_s4 + $0x360] sm:$0xff] }
 0x3d7   : > { %2070 = vmatpush1.bf16.msra.mxu0 %v2069_v38  ;;  %v1267_v47 = vrot.slane %v2910_v46, 4  ;;  %v2111_v38 = vpack.c.bf16 %v1380_v56, %v1378_v36  ;;  %v1603_v36 = vsub.s32 7, %v1400_v14 }
 0x3d8   : > { %2072 = vmatprep.subr.bf16.mxu0 %v2071_v40  ;;  %v1379_v40 = vld [vmem:[%s3101_s4 + $0x370] sm:$0xff] }
 0x3d9   : > { %1544 = vmatprep.mubr.f32.mxu0 %v1267_v47  ;;  %v2113_v43 = vpack.c.bf16 %v1379_v40, %v1377_v39  ;;  %v1381_v47 = vld [vmem:[%s3101_s4 + $0x380] sm:$0xff]  ;;  %v1596_v39 = vrot.slane %v1571_v17, %v1595_v28 }
 0x3db   : > { %2074 = vmatpush1.bf16.msra.mxu0 %v2073_v51  ;;  %v1383_v51 = vld [vmem:[%s3101_s4 + $0x390] sm:$0xff] }
 0x3dc   : > { %2076 = vmatprep.subr.bf16.mxu0 %v2075_v55  ;;  %v1386_v55 = vld [vmem:[%s3101_s4 + $0x3a8] sm:$0xff]  ;;  %v2117_v59 = vpack.c.bf16 %v1383_v51, %v1381_v47 }
 0x3dd   : > { %v2119_v61 = vpack.c.bf16 %v1388_v57, %v1386_v55  ;;  %v1604_v55 = vrot.slane %v1571_v17, %v1603_v36 }
 0x3df   : > { %2078 = vmatpush1.bf16.msra.mxu0 %v2077_v1  ;;  %v1387_v1 = vld [vmem:[%s3101_s4 + $0x3b0] sm:$0xff] }
 0x3e0   : > { %2080 = vmatprep.subr.bf16.mxu0 %v2079_v2  ;;  %v1390_v2 = vld [vmem:[%s3101_s4 + $0x3c8] sm:$0xff]  ;;  %v2121_v4 = vpack.c.bf16 %v1387_v1, %v1385_v63 }
 0x3e1   : > { %v2123_v5 = vpack.c.bf16 %v1392_v3, %v1390_v2 }
 0x3e3   : > { %2082 = vmatpush1.bf16.msra.mxu0 %v2081_v7  ;;  %v1391_v7 = vld [vmem:[%s3101_s4 + $0x3d0] sm:$0xff] }
 0x3e4   : > { %2084 = vmatprep.subr.bf16.mxu0 %v2083_v58  ;;  %v1394_v58 = vld [vmem:[%s3101_s4 + $0x3e8] sm:$0xff]  ;;  %v2125_v9 = vpack.c.bf16 %v1391_v7, %v1389_v6 }
 0x3e5   : > { %v2127_v11 = vpack.c.bf16 %v1396_v60, %v1394_v58 }
 0x3e7   : > { %2086 = vmatpush1.bf16.msra.mxu0 %v2085_v13  ;;  %v1395_v13 = vld [vmem:[%s3101_s4 + $0x3f0] sm:$0xff] }
 0x3e8   : > { %2088 = vmatprep.subr.bf16.mxu0 %v2087_v10  ;;  %v2129_v10 = vpack.c.bf16 %v1395_v13, %v1393_v12 }
 0x3eb   : > { %2090 = vmatpush1.bf16.msra.mxu0 %v2089_v19  ;;  %v1405_v19 = vsub.s32 1, %v1400_v14 }
 0x3ec   : > { %2092 = vmatprep.subr.bf16.mxu0 %v2091_v8  ;;  %v1402_v8 = vrot.slane %v1397_v15, %v1401_v48 }
 0x3ed   : > { %v1406_v16 = vrot.slane %v1397_v15, %v1405_v19  ;;  %v1580_v22 = vrot.slane %v1571_v17, %v1405_v19 }
 0x3ef   : > { %2094 = vmatpush1.bf16.msra.mxu0 %v2093_v49 }
 0x3f0   : > { %2096 = vmatprep.subr.bf16.mxu0 %v2095_v53 }
 0x3f3   : > { %2098 = vmatpush1.bf16.msra.mxu0 %v2097_v23  ;;  %v1591_v23 = vsub.s32 4, %v1400_v14 }
 0x3f4   : > { %2100 = vmatprep.subr.bf16.mxu0 %v2099_v24  ;;  %v1584_v24 = vrot.slane %v1571_v17, %v1583_v45 }
 0x3f7   : > { %2102 = vmatpush1.bf16.msra.mxu0 %v2101_v29 }
 0x3f8   : > { %2104 = vmatprep.subr.bf16.mxu0 %v2103_v30 }
 0x3fb   : > { %2106 = vmatpush1.bf16.msra.mxu0 %v2105_v50 }
 0x3fc   : > { %2108 = vmatprep.subr.bf16.mxu0 %v2107_v35  ;;  %v1592_v35 = vrot.slane %v1571_v17, %v1591_v23 }
 0x3ff   : > { %2110 = vmatpush1.bf16.msra.mxu0 %v2109_v37 }
 0x400   : > { %2112 = vmatprep.subr.bf16.mxu0 %v2111_v38 }
 0x403   : > { %2114 = vmatpush1.bf16.msra.mxu0 %v2113_v43  ;;  %v1600_v43 = vrot.slane %v1571_v17, %v1599_v32 }
 0x404   : > { %2116 = vmatprep.subr.bf16.mxu0 %v2115_v44 }
 0x407   : > { %2118 = vmatpush1.bf16.msra.mxu0 %v2117_v59 }
 0x408   : > { %2120 = vmatprep.subr.bf16.mxu0 %v2119_v61 }
 0x40b   : > { %2122 = vmatpush1.bf16.msra.mxu0 %v2121_v4 }
 0x40c   : > { %2124 = vmatprep.subr.bf16.mxu0 %v2123_v5 }
 0x40f   : > { %2126 = vmatpush1.bf16.msra.mxu0 %v2125_v9  ;;  %v1639_v9 = vld [vmem:[#allocation2] sm:$0x1] }
 0x410   : > { %2128 = vmatprep.subr.bf16.mxu0 %v2127_v11 }
 0x413   : > { %2130 = vmatpush1.bf16.msra.mxu0 %v2129_v10 }
 0x416   : > { %1545 = vmatmul.mubr.f32.vlgmr.msra.gmra.mrb[0].mxu0 %v2910_v46  ;;  %v1576_v46 = vrot.slane %v1571_v17, %v1401_v48 }
 0x4e9   : > { %v1546_v18 = vpop.f32.mrb[0].mxu0 }
 0x4ea   : > { %v2131_v49 = vadd.f32 %v1546_v18, %v1402_v8  ;;  %v1548_v53 = vpop.f32.mrb[1].mxu0 }
 0x4eb   : > { %v2132_v21 = vadd.f32 %v1548_v53, %v1406_v16 }
 0x4ec   : > { %vm1551_vm1 = vcmp.ge.f32.partialorder %v2131_v49, 0.0  ;;  %v1553_v0 = vmul.f32 0.2, %v2131_v49 }
 0x4ed   : > { %vm1552_vm2 = vcmp.ge.f32.partialorder %v2132_v21, 0.0  ;;  %v1554_v25 = vmul.f32 0.2, %v2132_v21 }
 0x4ee   : > { %v1555_v26 = vsel %vm1551_vm1, %v2131_v49, %v1553_v0 }
 0x4ef   : > { %v1559_v29 = vrot.slane %v1555_v26, 1  ;;  %v1613_v30 = vmul.f32 %v1576_v46, %v1555_v26  ;;  %v1556_v31 = vsel %vm1552_vm2, %v2132_v21, %v1554_v25  ;;  %v1563_v33 = vrot.slane %v1555_v26, 2 }
 0x4f0   : > { %v1560_v34 = vrot.slane %v1556_v31, 1  ;;  %v1614_v50 = vmul.f32 %v1580_v22, %v1556_v31  ;;  %v1564_v56 = vrot.slane %v1556_v31, 2  ;;  %v1567_v42 = vrot.slane %v1555_v26, 3 }
 0x4f1   : > { %v1615_v52 = vmul.f32 %v1584_v24, %v1559_v29  ;;  %v1622_v54 = vsel %vm1621_vm3, %v1613_v30, 0.0  ;;  %v1617_v44 = vmul.f32 %v1592_v35, %v1563_v33  ;;  %v1568_v51 = vrot.slane %v1556_v31, 3 }
 0x4f2   : > { %v1616_v37 = vmul.f32 %v1588_v27, %v1560_v34  ;;  %v1623_v38 = vsel %vm1621_vm3, %v1614_v50, 0.0  ;;  %v1618_v57 = vmul.f32 %v1596_v39, %v1564_v56  ;;  %v1619_v63 = vmul.f32 %v1600_v43, %v1567_v42 }
 0x4f3   : > { %v1624_v40 = vadd.f32 %v1623_v38, %v1622_v54  ;;  %v1625_v41 = vsel %vm1621_vm3, %v1615_v52, 0.0  ;;  %v1629_v1 = vsel %vm1621_vm3, %v1617_v44, 0.0  ;;  %v1620_v3 = vmul.f32 %v1604_v55, %v1568_v51 }
 0x4f4   : > { %v1627_v59 = vsel %vm1621_vm3, %v1616_v37, 0.0  ;;  %v1631_v4 = vsel %vm1621_vm3, %v1618_v57, 0.0  ;;  %v1633_v6 = vsel %vm1621_vm3, %v1619_v63, 0.0 }
 0x4f5   : > { %v1626_v47 = vadd.f32 %v1625_v41, %v1624_v40  ;;  %v1635_v58 = vsel %vm1621_vm3, %v1620_v3, 0.0 }
 0x4f7   : > { %v1628_v61 = vadd.f32 %v1627_v59, %v1626_v47 }
 0x4f9   : > { %v1630_v2 = vadd.f32 %v1629_v1, %v1628_v61 }
 0x4fb   : > { %v1632_v5 = vadd.f32 %v1631_v4, %v1630_v2 }
 0x4fd   : > { %v1634_v7 = vadd.f32 %v1633_v6, %v1632_v5 }
 0x4ff   : > { %v1636_v60 = vadd.f32 %v1635_v58, %v1634_v7 }
 0x501   : > { %1637 = vadd.xlane.f32.xlu0 %v1636_v60 }
 0x58e   : > { %v1638_v11 = vpop.xlane.xlu0 %1637 }
 0x58f   : > { %v1640_v12 = vadd.f32 %v1639_v9, %v1638_v11 }
 0x591   : > { %v1641_v13 = vsub.f32 0.0, %v1640_v12 }
 0x593   : > { %v1642_v10 = vmul.f32 1.442695, %v1641_v13 }
 0x595   : > { %2217 = vpow2.f32 %v1642_v10 }
 0x59f   : > { %v2218_v20 = vpop.eup %2217 }
 0x5a0   : > { %v1644_v14 = vadd.f32 1.0, %v2218_v20 }
 0x5a2   : > { %2219 = vrcp.f32 %v1644_v14 }
 0x5ac   : > { %v2220_v48 = vpop.eup %2219 }
 0x5ad   : > { %1647 = vst.msk [vmem:[%s384_s22] sm:$0x1] %vm1646_vm4, %v2220_v48 }
 0x5ae PF: > { %s23_s19 = sadd.s32 1, %s2227_s19  }
 0x5af   : > { %p20_p4 = scmp.ge.s32.totalorder %s23_s19, 6  }
 0x5b1   :  { %22 = sbr.rel (!%p20_p4) target bundleno = 3 (0x3), region = 94 }

</bundles_post_ra>
